<compile_context>
chip_gen: v7x
topology: tpu7x:2x2x1
jax: 0.10.0
libtpu: 0.0.40
codegen_flags: <defaults>
</compile_context>

<pallas_src>
import functools

import jax
import jax.numpy as jnp
from jax.experimental import pallas as pl
from jax.experimental.pallas import tpu as pltpu

_LANE = 128          # pad every feature dim to this many lanes
_NEG = -1e30         # bias for padded gate-logit columns (never wins argmax)


def _round_up(x, m):
    return ((x + m - 1) // m) * m


# ----------------------------- Pallas kernel --------------------------------

def fused_moe_kernel(x_ref, w_ref, b_ref, ow_ref, ob_ref, o_ref, xpad_ref, *,
                     num_layers, num_experts, dpad, din):
    """Full model forward for one tile of tokens.

    x_ref   : (Tt, din)            bf16 unpadded token tile (last dim == array dim)
    w_ref   : (L, dpad, (E+1)*dpad) bf16 per-layer fused [gate | experts] weights
    b_ref   : (L, 1, (E+1)*dpad)    f32 fused biases (-1e30 on padded gate cols)
    ow_ref  : (dpad, dpad)          bf16 output Linear weight (padded)
    ob_ref  : (1, dpad)             f32 output Linear bias (padded)
    o_ref   : (Tt, dpad)            f32 padded output tile (lane-dense store)
    xpad_ref: (Tt, dpad)            bf16 scratch: lane-pads the input tile in VMEM
    """
    tt = x_ref.shape[0]

    # Lane-pad the input inside the kernel (avoids a host-side padded HBM copy).
    if din < dpad:
        xpad_ref[...] = jnp.zeros(xpad_ref.shape, jnp.bfloat16)
        xpad_ref[:, :din] = x_ref[...]
        hb = xpad_ref[...]                                   # (Tt, dpad) bf16
    else:
        hb = x_ref[...]

    # hoisted iota for first-argmax tie-breaking (JAX does not CSE broadcasts)
    col = jax.lax.broadcasted_iota(jnp.int32, (tt, dpad), 1)

    for l in range(num_layers):                              # static unroll
        # One wide bf16 MXU pass with f32 accumulation:
        #   [ gate logits | expert_0 out | ... | expert_{E-1} out ]
        y = jnp.dot(hb, w_ref[l], preferred_element_type=jnp.float32) + b_ref[l]

        # gate: softmax is monotone -> argmax(softmax(logits)) == argmax(logits).
        logits = y[:, :dpad]                                 # padded cols = -1e30
        m = jnp.max(logits, axis=-1, keepdims=True)
        sel = jnp.min(jnp.where(logits == m, col, dpad),
                      axis=-1, keepdims=True)                # (Tt, 1) first argmax

        # top-1 combine: select chain over 128-lane aligned expert slabs (f32 VPU)
        acc = y[:, dpad:2 * dpad]                            # expert 0 slab
        for e in range(1, num_experts):
            acc = jnp.where(sel == e, y[:, (e + 1) * dpad:(e + 2) * dpad], acc)

        hb = acc.astype(jnp.bfloat16)                        # bf16 only at MXU input

    out = jnp.dot(hb, ow_ref[...], preferred_element_type=jnp.float32) + ob_ref[...]
    o_ref[...] = out.astype(o_ref.dtype)


# ------------------------------ pallas_call wrapper --------------------------

def _const_block_spec(shape):
    """BlockSpec for a weight block that is constant across the grid.

    Single-buffered (pipeline_mode=Buffered(1)) when supported — the block
    never changes, so double-buffering only wastes VMEM."""
    index_map = lambda i: (0,) * len(shape)
    try:
        return pl.BlockSpec(shape, index_map,
                            pipeline_mode=pl.Buffered(buffer_count=1))
    except Exception:  # older jax: no pipeline_mode / Buffered
        return pl.BlockSpec(shape, index_map)


def fused_forward(x, fused, *, output_size, token_tile=512):
    """x: (B, S, input_size) -> (B, S, output_size). Single pallas_call."""
    B, S, din = x.shape
    T = B * S
    w_stack = fused["w"]            # (L, dpad, (E+1)*dpad)  bf16
    b_stack = fused["b"]            # (L, 1, (E+1)*dpad)     f32
    ow = fused["out_w"]             # (dpad, dpad)           bf16
    ob = fused["out_b"]             # (1, dpad)              f32
    L, dpad, ncol = w_stack.shape
    E = ncol // dpad - 1

    # Token tile: big enough to amortize per-grid-step overhead, but always at
    # least 2 tiles when T > 8 so the "parallel" axis can use both v7x TCs.
    tile = min(token_tile, _round_up(T, 8))
    if T > 8:
        tile = min(tile, _round_up(-(-T // 2), 8))
    tile = max(tile, 8)
    Tp = _round_up(T, tile)

    # Pass the input UNPADDED in lanes (din == full last dim -> legal block),
    # cast to bf16; only row-pad when the grid needs it.
    x2d = x.reshape(T, din).astype(jnp.bfloat16)
    if Tp > T:
        x2d = jnp.zeros((Tp, din), jnp.bfloat16).at[:T].set(x2d)

    # Explicit VMEM budget (weights counted double-buffered for safety).
    weight_bytes = L * dpad * ncol * 2 + L * ncol * 4 + dpad * dpad * 2 + dpad * 4
    act_bytes = (2 * tile * din * 2        # x tiles (bf16, double-buffered)
                 + 2 * tile * dpad * 4     # out tiles (f32, double-buffered)
                 + tile * dpad * 2         # lane-pad scratch
                 + 2 * tile * ncol * 4     # wide per-layer activation (f32)
                 + 8 * tile * dpad * 4)    # h/acc/select temporaries
    vmem_limit = int(min(64 << 20,
                         max(32 << 20, 2 * weight_bytes + act_bytes + (4 << 20))))
    # TODO(synk): if 2*weight_bytes approaches ~48 MiB (v7x has only 64 MiB VMEM
    # per TensorCore), add an "arbitrary" layer grid axis and stream per-layer
    # weights instead of keeping all L layers resident.
    # TODO(synk): for large E (>=8) or hidden (>=512) the dense all-experts wide
    # matmul becomes MXU-bound (earliest on v5e); switch to a grouped top-1
    # matmul with scalar-prefetched group offsets in that regime.

    kernel = functools.partial(fused_moe_kernel, num_layers=L, num_experts=E,
                               dpad=dpad, din=din)

    def run(single_buffer_weights):
        if single_buffer_weights:
            wspec = _const_block_spec
        else:
            wspec = lambda s: pl.BlockSpec(s, lambda i: (0,) * len(s))
        return pl.pallas_call(
            kernel,
            out_shape=jax.ShapeDtypeStruct((Tp, dpad), jnp.float32),
            grid_spec=pltpu.PrefetchScalarGridSpec(
                num_scalar_prefetch=0,
                grid=(Tp // tile,),
                in_specs=[
                    pl.BlockSpec((tile, din), lambda i: (i, 0)),
                    wspec((L, dpad, ncol)),
                    wspec((L, 1, ncol)),
                    wspec((dpad, dpad)),
                    wspec((1, dpad)),
                ],
                out_specs=pl.BlockSpec((tile, dpad), lambda i: (i, 0)),
                scratch_shapes=[pltpu.VMEM((tile, dpad), jnp.bfloat16)],
            ),
            compiler_params=pltpu.CompilerParams(
                dimension_semantics=("parallel",),
                vmem_limit_bytes=vmem_limit),
        )(x2d, w_stack, b_stack, ow, ob)

    try:
        yp = run(True)
    except Exception:
        # Fallback for builds that reject pipeline_mode=Buffered(1) on
        # pallas_call BlockSpecs; double-buffered weights only cost extra VMEM.
        yp = run(False)

    return yp[:T, :output_size].reshape(B, S, output_size)


# ------------------------------ parameter setup ------------------------------

def _init_linear(key, fan_in, fan_out):
    """nn.Linear default init (U(-1/sqrt(fan_in), 1/sqrt(fan_in))),
    weight stored pre-transposed as (fan_in, fan_out)."""
    k = 1.0 / jnp.sqrt(jnp.float32(fan_in))
    kw, kb = jax.random.split(key)
    w = jax.random.uniform(kw, (fan_in, fan_out), jnp.float32, -k, k)
    b = jax.random.uniform(kb, (fan_out,), jnp.float32, -k, k)
    return w, b


def init_model_params(key, num_experts, input_size, hidden_size, output_size,
                      num_layers):
    layers = []
    for i in range(num_layers):
        din = input_size if i == 0 else hidden_size
        dout = hidden_size
        key, kg, ke = jax.random.split(key, 3)
        gw, gb = _init_linear(kg, din, num_experts)
        ews, ebs = [], []
        for _ in range(num_experts):
            ke, kk = jax.random.split(ke)
            w, b = _init_linear(kk, din, dout)
            ews.append(w)
            ebs.append(b)
        layers.append(dict(gate_w=gw, gate_b=gb,
                           expert_w=jnp.stack(ews),        # (E, Din, Dout)
                           expert_b=jnp.stack(ebs)))       # (E, Dout)
    key, ko = jax.random.split(key)
    out_w, out_b = _init_linear(ko, hidden_size, output_size)
    return dict(layers=layers, out_w=out_w, out_b=out_b,
                num_experts=num_experts, input_size=input_size,
                hidden_size=hidden_size, output_size=output_size)


def pack_fused_params(params):
    """Pad + fuse gate and expert weights into per-layer wide bf16 matrices."""
    E = params["num_experts"]
    dpad = _round_up(max(params["input_size"], params["hidden_size"],
                         params["output_size"], E), _LANE)
    ncol = (E + 1) * dpad
    w_list, b_list = [], []
    for lp in params["layers"]:
        din = lp["gate_w"].shape[0]
        dout = lp["expert_w"].shape[2]
        W = jnp.zeros((dpad, ncol), jnp.float32)
        b = jnp.zeros((1, ncol), jnp.float32)
        # gate block (lane block 0)
        W = W.at[:din, :E].set(lp["gate_w"])
        b = b.at[0, :E].set(lp["gate_b"])
        b = b.at[0, E:dpad].set(_NEG)             # padded logits never selected
        # expert blocks (lane blocks 1..E)
        for e in range(E):
            c0 = (e + 1) * dpad
            W = W.at[:din, c0:c0 + dout].set(lp["expert_w"][e])
            b = b.at[0, c0:c0 + dout].set(lp["expert_b"][e])
        w_list.append(W.astype(jnp.bfloat16))     # bf16 at the MXU
        b_list.append(b)                          # biases stay f32
    out_w = jnp.zeros((dpad, dpad), jnp.float32).at[
        :params["hidden_size"], :params["output_size"]].set(params["out_w"])
    out_b = jnp.zeros((1, dpad), jnp.float32).at[
        0, :params["output_size"]].set(params["out_b"])
    return dict(w=jnp.stack(w_list),              # (L, dpad, (E+1)*dpad) bf16
                b=jnp.stack(b_list),              # (L, 1, (E+1)*dpad)    f32
                out_w=out_w.astype(jnp.bfloat16),
                out_b=out_b)


# ------------------------------ pure-JAX reference ---------------------------
# Mirrors the kernel's numeric path (bf16 matmul inputs, f32 accumulation, f32
# biases/routing) so the top-1 expert selection matches exactly.

def _moe_layer_ref(h, gw, gb, ew, eb):
    hb = h.astype(jnp.bfloat16)
    logits = jnp.dot(hb, gw.astype(jnp.bfloat16),
                     preferred_element_type=jnp.float32) + gb
    sel = jnp.argmax(jax.nn.softmax(logits, axis=-1), axis=-1)      # (T,)
    ys = jnp.einsum("td,edo->teo", hb, ew.astype(jnp.bfloat16),
                    preferred_element_type=jnp.float32) + eb[None]  # (T, E, Dout)
    return ys[jnp.arange(h.shape[0]), sel]


def model_forward_ref(x, params):
    B, S, _ = x.shape
    h = x.reshape(-1, x.shape[-1]).astype(jnp.float32)
    for lp in params["layers"]:
        h = _moe_layer_ref(h, lp["gate_w"], lp["gate_b"],
                           lp["expert_w"], lp["expert_b"])
    hb = h.astype(jnp.bfloat16)
    y = jnp.dot(hb, params["out_w"].astype(jnp.bfloat16),
                preferred_element_type=jnp.float32) + params["out_b"]
    return y.reshape(B, S, -1)


# ----------------------------------- main ------------------------------------

if __name__ == "__main__":
    num_experts = 4
    input_size = 32
    hidden_size = 32
    output_size = 16
    num_layers = 2
    batch, seq = 2, 8            # T = 16 tokens per device (world_size = 1)

    key = jax.random.PRNGKey(0)
    kx, kp = jax.random.split(key)
    x = jax.random.normal(kx, (batch, seq, input_size), jnp.float32)
    params = init_model_params(kp, num_experts, input_size, hidden_size,
                               output_size, num_layers)
    fused = pack_fused_params(params)

    out = fused_forward(x, fused, output_size=output_size)
    out = jax.block_until_ready(out)

    ref = model_forward_ref(x, params)
    assert out.shape == (batch, seq, output_size)
    assert jnp.allclose(out, ref, atol=2e-3, rtol=2e-3), "mismatch vs reference"

    print("KERNEL_OK")
</pallas_src>

<mosaic_0001>
module attributes {stable_mosaic.version = 11 : i64} {
  func.func @fused_moe_kernel(%arg0: i32, %arg1: memref<8x32xbf16, #tpu.memory_space<vmem>>, %arg2: memref<2x128x640xbf16, #tpu.memory_space<vmem>>, %arg3: memref<2x1x640xf32, #tpu.memory_space<vmem>>, %arg4: memref<128x128xbf16, #tpu.memory_space<vmem>>, %arg5: memref<1x128xf32, #tpu.memory_space<vmem>>, %arg6: memref<8x128xf32, #tpu.memory_space<vmem>>, %arg7: memref<8x128xbf16, #tpu.memory_space<vmem>>) attributes {dimension_semantics = [#tpu.dimension_semantics<parallel>], iteration_bounds = array<i64: 2>, scalar_prefetch = 0 : i64, scratch_operands = 1 : i64, tpu.core_type = #tpu.core_type<tc>, window_params = [{transform_indices = @transform_0, window_bounds = array<i64: 8, 32>}, {pipeline_mode = #tpu.pipeline_mode<synchronous>, transform_indices = @transform_1, window_bounds = array<i64: 2, 128, 640>}, {pipeline_mode = #tpu.pipeline_mode<synchronous>, transform_indices = @transform_2, window_bounds = array<i64: 2, 1, 640>}, {pipeline_mode = #tpu.pipeline_mode<synchronous>, transform_indices = @transform_3, window_bounds = array<i64: 128, 128>}, {pipeline_mode = #tpu.pipeline_mode<synchronous>, transform_indices = @transform_4, window_bounds = array<i64: 1, 128>}, {transform_indices = @transform_5, window_bounds = array<i64: 8, 128>}]} {
    %cst = arith.constant 0.000000e+00 : bf16
    %0 = vector.broadcast %cst : bf16 to vector<8x128xbf16>
    %c0 = arith.constant 0 : index
    %c0_0 = arith.constant 0 : index
    %1 = vector.load %arg7[%c0, %c0_0] : memref<8x128xbf16, #tpu.memory_space<vmem>>, vector<8x128xbf16>
    tpu.vector_store %arg7[%c0, %c0_0], %0 {strides = array<i32>} : memref<8x128xbf16, #tpu.memory_space<vmem>>, vector<8x128xbf16>,
    %c0_1 = arith.constant 0 : index
    %c0_2 = arith.constant 0 : index
    %2 = vector.load %arg1[%c0_1, %c0_2] : memref<8x32xbf16, #tpu.memory_space<vmem>>, vector<8x32xbf16>
    %c0_3 = arith.constant 0 : index
    %c0_4 = arith.constant 0 : index
    %3 = vector.load %arg7[%c0_3, %c0_4] : memref<8x128xbf16, #tpu.memory_space<vmem>>, vector<8x32xbf16>
    tpu.vector_store %arg7[%c0_3, %c0_4], %2 {strides = array<i32>} : memref<8x128xbf16, #tpu.memory_space<vmem>>, vector<8x32xbf16>,
    %c0_5 = arith.constant 0 : index
    %c0_6 = arith.constant 0 : index
    %4 = vector.load %arg7[%c0_5, %c0_6] : memref<8x128xbf16, #tpu.memory_space<vmem>>, vector<8x128xbf16>
    %5 = tpu.iota {dimensions = array<i32: 1>} : vector<8x128xi32>
    %c0_7 = arith.constant 0 : index
    %c0_8 = arith.constant 0 : index
    %c0_9 = arith.constant 0 : index
    %6 = vector.load %arg2[%c0_7, %c0_8, %c0_9] : memref<2x128x640xbf16, #tpu.memory_space<vmem>>, vector<1x128x640xbf16>
    %7 = vector.shape_cast %6 : vector<1x128x640xbf16> to vector<128x640xbf16>
    %cst_10 = arith.constant dense<0.000000e+00> : vector<8x640xf32>
    %8 = tpu.matmul %4, %7, %cst_10 {dimension_numbers = #tpu.dot_dimension_numbers<[1], [0], [0], [1], [0, 0, 1, 1], [], []>} : vector<8x128xbf16>, vector<128x640xbf16>, vector<8x640xf32> -> vector<8x640xf32>
    %c0_11 = arith.constant 0 : index
    %c0_12 = arith.constant 0 : index
    %c0_13 = arith.constant 0 : index
    %9 = vector.load %arg3[%c0_11, %c0_12, %c0_13] : memref<2x1x640xf32, #tpu.memory_space<vmem>>, vector<1x1x640xf32>
    %10 = vector.shape_cast %9 : vector<1x1x640xf32> to vector<1x640xf32>
    %11 = vector.broadcast %10 : vector<1x640xf32> to vector<8x640xf32>
    %12 = arith.addf %8, %11 : vector<8x640xf32>
    %13 = vector.extract_strided_slice %12 {offsets = [0, 0], sizes = [8, 128], strides = [1, 1]} : vector<8x640xf32> to vector<8x128xf32>
    %cst_14 = arith.constant dense<0xFF800000> : vector<8xf32>
    %14 = vector.multi_reduction <maximumf>, %13, %cst_14 [1] : vector<8x128xf32> to vector<8xf32>
    %15 = vector.shape_cast %14 : vector<8xf32> to vector<8x1xf32>
    %16 = vector.broadcast %15 : vector<8x1xf32> to vector<8x128xf32>
    %17 = arith.cmpf oeq, %13, %16 : vector<8x128xf32>
    %c128_i32 = arith.constant 128 : i32
    %18 = vector.broadcast %c128_i32 : i32 to vector<8x128xi32>
    %19 = arith.select %17, %5, %18 : vector<8x128xi1>, vector<8x128xi32>
    %cst_15 = arith.constant dense<2147483647> : vector<8xi32>
    %20 = vector.multi_reduction <minsi>, %19, %cst_15 [1] : vector<8x128xi32> to vector<8xi32>
    %21 = vector.shape_cast %20 : vector<8xi32> to vector<8x1xi32>
    %22 = vector.extract_strided_slice %12 {offsets = [0, 128], sizes = [8, 128], strides = [1, 1]} : vector<8x640xf32> to vector<8x128xf32>
    %c1_i32 = arith.constant 1 : i32
    %23 = vector.broadcast %c1_i32 : i32 to vector<8x1xi32>
    %24 = arith.cmpi eq, %21, %23 : vector<8x1xi32>
    %25 = vector.extract_strided_slice %12 {offsets = [0, 256], sizes = [8, 128], strides = [1, 1]} : vector<8x640xf32> to vector<8x128xf32>
    %26 = vector.shape_cast %24 : vector<8x1xi1> to vector<8x1xi1>
    %27 = vector.broadcast %26 : vector<8x1xi1> to vector<8x128xi1>
    %28 = arith.select %27, %25, %22 : vector<8x128xi1>, vector<8x128xf32>
    %c2_i32 = arith.constant 2 : i32
    %29 = vector.broadcast %c2_i32 : i32 to vector<8x1xi32>
    %30 = arith.cmpi eq, %21, %29 : vector<8x1xi32>
    %31 = vector.extract_strided_slice %12 {offsets = [0, 384], sizes = [8, 128], strides = [1, 1]} : vector<8x640xf32> to vector<8x128xf32>
    %32 = vector.shape_cast %30 : vector<8x1xi1> to vector<8x1xi1>
    %33 = vector.broadcast %32 : vector<8x1xi1> to vector<8x128xi1>
    %34 = arith.select %33, %31, %28 : vector<8x128xi1>, vector<8x128xf32>
    %c3_i32 = arith.constant 3 : i32
    %35 = vector.broadcast %c3_i32 : i32 to vector<8x1xi32>
    %36 = arith.cmpi eq, %21, %35 : vector<8x1xi32>
    %37 = vector.extract_strided_slice %12 {offsets = [0, 512], sizes = [8, 128], strides = [1, 1]} : vector<8x640xf32> to vector<8x128xf32>
    %38 = vector.shape_cast %36 : vector<8x1xi1> to vector<8x1xi1>
    %39 = vector.broadcast %38 : vector<8x1xi1> to vector<8x128xi1>
    %40 = arith.select %39, %37, %34 : vector<8x128xi1>, vector<8x128xf32>
    %41 = arith.truncf %40 : vector<8x128xf32> to vector<8x128xbf16>
    %c1 = arith.constant 1 : index
    %c0_16 = arith.constant 0 : index
    %c0_17 = arith.constant 0 : index
    %42 = vector.load %arg2[%c1, %c0_16, %c0_17] : memref<2x128x640xbf16, #tpu.memory_space<vmem>>, vector<1x128x640xbf16>
    %43 = vector.shape_cast %42 : vector<1x128x640xbf16> to vector<128x640xbf16>
    %cst_18 = arith.constant dense<0.000000e+00> : vector<8x640xf32>
    %44 = tpu.matmul %41, %43, %cst_18 {dimension_numbers = #tpu.dot_dimension_numbers<[1], [0], [0], [1], [0, 0, 1, 1], [], []>} : vector<8x128xbf16>, vector<128x640xbf16>, vector<8x640xf32> -> vector<8x640xf32>
    %c1_19 = arith.constant 1 : index
    %c0_20 = arith.constant 0 : index
    %c0_21 = arith.constant 0 : index
    %45 = vector.load %arg3[%c1_19, %c0_20, %c0_21] : memref<2x1x640xf32, #tpu.memory_space<vmem>>, vector<1x1x640xf32>
    %46 = vector.shape_cast %45 : vector<1x1x640xf32> to vector<1x640xf32>
    %47 = vector.broadcast %46 : vector<1x640xf32> to vector<8x640xf32>
    %48 = arith.addf %44, %47 : vector<8x640xf32>
    %49 = vector.extract_strided_slice %48 {offsets = [0, 0], sizes = [8, 128], strides = [1, 1]} : vector<8x640xf32> to vector<8x128xf32>
    %cst_22 = arith.constant dense<0xFF800000> : vector<8xf32>
    %50 = vector.multi_reduction <maximumf>, %49, %cst_22 [1] : vector<8x128xf32> to vector<8xf32>
    %51 = vector.shape_cast %50 : vector<8xf32> to vector<8x1xf32>
    %52 = vector.broadcast %51 : vector<8x1xf32> to vector<8x128xf32>
    %53 = arith.cmpf oeq, %49, %52 : vector<8x128xf32>
    %c128_i32_23 = arith.constant 128 : i32
    %54 = vector.broadcast %c128_i32_23 : i32 to vector<8x128xi32>
    %55 = arith.select %53, %5, %54 : vector<8x128xi1>, vector<8x128xi32>
    %cst_24 = arith.constant dense<2147483647> : vector<8xi32>
    %56 = vector.multi_reduction <minsi>, %55, %cst_24 [1] : vector<8x128xi32> to vector<8xi32>
    %57 = vector.shape_cast %56 : vector<8xi32> to vector<8x1xi32>
    %58 = vector.extract_strided_slice %48 {offsets = [0, 128], sizes = [8, 128], strides = [1, 1]} : vector<8x640xf32> to vector<8x128xf32>
    %c1_i32_25 = arith.constant 1 : i32
    %59 = vector.broadcast %c1_i32_25 : i32 to vector<8x1xi32>
    %60 = arith.cmpi eq, %57, %59 : vector<8x1xi32>
    %61 = vector.extract_strided_slice %48 {offsets = [0, 256], sizes = [8, 128], strides = [1, 1]} : vector<8x640xf32> to vector<8x128xf32>
    %62 = vector.shape_cast %60 : vector<8x1xi1> to vector<8x1xi1>
    %63 = vector.broadcast %62 : vector<8x1xi1> to vector<8x128xi1>
    %64 = arith.select %63, %61, %58 : vector<8x128xi1>, vector<8x128xf32>
    %c2_i32_26 = arith.constant 2 : i32
    %65 = vector.broadcast %c2_i32_26 : i32 to vector<8x1xi32>
    %66 = arith.cmpi eq, %57, %65 : vector<8x1xi32>
    %67 = vector.extract_strided_slice %48 {offsets = [0, 384], sizes = [8, 128], strides = [1, 1]} : vector<8x640xf32> to vector<8x128xf32>
    %68 = vector.shape_cast %66 : vector<8x1xi1> to vector<8x1xi1>
    %69 = vector.broadcast %68 : vector<8x1xi1> to vector<8x128xi1>
    %70 = arith.select %69, %67, %64 : vector<8x128xi1>, vector<8x128xf32>
    %c3_i32_27 = arith.constant 3 : i32
    %71 = vector.broadcast %c3_i32_27 : i32 to vector<8x1xi32>
    %72 = arith.cmpi eq, %57, %71 : vector<8x1xi32>
    %73 = vector.extract_strided_slice %48 {offsets = [0, 512], sizes = [8, 128], strides = [1, 1]} : vector<8x640xf32> to vector<8x128xf32>
    %74 = vector.shape_cast %72 : vector<8x1xi1> to vector<8x1xi1>
    %75 = vector.broadcast %74 : vector<8x1xi1> to vector<8x128xi1>
    %76 = arith.select %75, %73, %70 : vector<8x128xi1>, vector<8x128xf32>
    %77 = arith.truncf %76 : vector<8x128xf32> to vector<8x128xbf16>
    %c0_28 = arith.constant 0 : index
    %c0_29 = arith.constant 0 : index
    %78 = vector.load %arg4[%c0_28, %c0_29] : memref<128x128xbf16, #tpu.memory_space<vmem>>, vector<128x128xbf16>
    %cst_30 = arith.constant dense<0.000000e+00> : vector<8x128xf32>
    %79 = tpu.matmul %77, %78, %cst_30 {dimension_numbers = #tpu.dot_dimension_numbers<[1], [0], [0], [1], [0, 0, 1, 1], [], []>} : vector<8x128xbf16>, vector<128x128xbf16>, vector<8x128xf32> -> vector<8x128xf32>
    %c0_31 = arith.constant 0 : index
    %c0_32 = arith.constant 0 : index
    %80 = vector.load %arg5[%c0_31, %c0_32] : memref<1x128xf32, #tpu.memory_space<vmem>>, vector<1x128xf32>
    %81 = vector.broadcast %80 : vector<1x128xf32> to vector<8x128xf32>
    %82 = arith.addf %79, %81 : vector<8x128xf32>
    %c0_33 = arith.constant 0 : index
    %c0_34 = arith.constant 0 : index
    %83 = vector.load %arg6[%c0_33, %c0_34] : memref<8x128xf32, #tpu.memory_space<vmem>>, vector<8x128xf32>
    tpu.vector_store %arg6[%c0_33, %c0_34], %82 {strides = array<i32>} : memref<8x128xf32, #tpu.memory_space<vmem>>, vector<8x128xf32>,
    return
  }
  func.func @transform_0(%arg0: i32) -> (i32, i32) {
    %c0_i32 = arith.constant 0 : i32
    %c0_i32_0 = arith.constant 0 : i32
    return %arg0, %c0_i32 : i32, i32
  }
  func.func @transform_1(%arg0: i32) -> (i32, i32, i32) {
    %c0_i32 = arith.constant 0 : i32
    %c0_i32_0 = arith.constant 0 : i32
    %c0_i32_1 = arith.constant 0 : i32
    %c0_i32_2 = arith.constant 0 : i32
    return %c0_i32, %c0_i32_0, %c0_i32_1 : i32, i32, i32
  }
  func.func @transform_2(%arg0: i32) -> (i32, i32, i32) {
    %c0_i32 = arith.constant 0 : i32
    %c0_i32_0 = arith.constant 0 : i32
    %c0_i32_1 = arith.constant 0 : i32
    %c0_i32_2 = arith.constant 0 : i32
    return %c0_i32, %c0_i32_0, %c0_i32_1 : i32, i32, i32
  }
  func.func @transform_3(%arg0: i32) -> (i32, i32) {
    %c0_i32 = arith.constant 0 : i32
    %c0_i32_0 = arith.constant 0 : i32
    %c0_i32_1 = arith.constant 0 : i32
    return %c0_i32, %c0_i32_0 : i32, i32
  }
  func.func @transform_4(%arg0: i32) -> (i32, i32) {
    %c0_i32 = arith.constant 0 : i32
    %c0_i32_0 = arith.constant 0 : i32
    %c0_i32_1 = arith.constant 0 : i32
    return %c0_i32, %c0_i32_0 : i32, i32
  }
  func.func @transform_5(%arg0: i32) -> (i32, i32) {
    %c0_i32 = arith.constant 0 : i32
    %c0_i32_0 = arith.constant 0 : i32
    return %arg0, %c0_i32 : i32, i32
  }
}

module attributes {stable_mosaic.version = 11 : i64} {
  func.func @fused_moe_kernel(%arg0: i32, %arg1: memref<8x32xbf16, #tpu.memory_space<vmem>>, %arg2: memref<2x128x640xbf16, #tpu.memory_space<vmem>>, %arg3: memref<2x1x640xf32, #tpu.memory_space<vmem>>, %arg4: memref<128x128xbf16, #tpu.memory_space<vmem>>, %arg5: memref<1x128xf32, #tpu.memory_space<vmem>>, %arg6: memref<8x128xf32, #tpu.memory_space<vmem>>, %arg7: memref<8x128xbf16, #tpu.memory_space<vmem>>) attributes {dimension_semantics = [#tpu.dimension_semantics<parallel>], iteration_bounds = array<i64: 2>, scalar_prefetch = 0 : i64, scratch_operands = 1 : i64, tpu.core_type = #tpu.core_type<tc>, window_params = [{transform_indices = @transform_0, window_bounds = array<i64: 8, 32>}, {pipeline_mode = #tpu.pipeline_mode<synchronous>, transform_indices = @transform_1, window_bounds = array<i64: 2, 128, 640>}, {pipeline_mode = #tpu.pipeline_mode<synchronous>, transform_indices = @transform_2, window_bounds = array<i64: 2, 1, 640>}, {pipeline_mode = #tpu.pipeline_mode<synchronous>, transform_indices = @transform_3, window_bounds = array<i64: 128, 128>}, {pipeline_mode = #tpu.pipeline_mode<synchronous>, transform_indices = @transform_4, window_bounds = array<i64: 1, 128>}, {transform_indices = @transform_5, window_bounds = array<i64: 8, 128>}]} {
    %cst = arith.constant 0.000000e+00 : bf16
    %0 = vector.broadcast %cst : bf16 to vector<8x128xbf16>
    %c0 = arith.constant 0 : index
    %c0_0 = arith.constant 0 : index
    %1 = vector.load %arg7[%c0, %c0_0] : memref<8x128xbf16, #tpu.memory_space<vmem>>, vector<8x128xbf16>
    tpu.vector_store %arg7[%c0, %c0_0], %0 {strides = array<i32>} : memref<8x128xbf16, #tpu.memory_space<vmem>>, vector<8x128xbf16>,
    %c0_1 = arith.constant 0 : index
    %c0_2 = arith.constant 0 : index
    %2 = vector.load %arg1[%c0_1, %c0_2] : memref<8x32xbf16, #tpu.memory_space<vmem>>, vector<8x32xbf16>
    %c0_3 = arith.constant 0 : index
    %c0_4 = arith.constant 0 : index
    %3 = vector.load %arg7[%c0_3, %c0_4] : memref<8x128xbf16, #tpu.memory_space<vmem>>, vector<8x32xbf16>
    tpu.vector_store %arg7[%c0_3, %c0_4], %2 {strides = array<i32>} : memref<8x128xbf16, #tpu.memory_space<vmem>>, vector<8x32xbf16>,
    %c0_5 = arith.constant 0 : index
    %c0_6 = arith.constant 0 : index
    %4 = vector.load %arg7[%c0_5, %c0_6] : memref<8x128xbf16, #tpu.memory_space<vmem>>, vector<8x128xbf16>
    %5 = tpu.iota {dimensions = array<i32: 1>} : vector<8x128xi32>
    %c0_7 = arith.constant 0 : index
    %c0_8 = arith.constant 0 : index
    %c0_9 = arith.constant 0 : index
    %6 = vector.load %arg2[%c0_7, %c0_8, %c0_9] : memref<2x128x640xbf16, #tpu.memory_space<vmem>>, vector<1x128x640xbf16>
    %7 = vector.shape_cast %6 : vector<1x128x640xbf16> to vector<128x640xbf16>
    %cst_10 = arith.constant dense<0.000000e+00> : vector<8x640xf32>
    %8 = tpu.matmul %4, %7, %cst_10 {dimension_numbers = #tpu.dot_dimension_numbers<[1], [0], [0], [1], [0, 0, 1, 1], [], []>} : vector<8x128xbf16>, vector<128x640xbf16>, vector<8x640xf32> -> vector<8x640xf32>
    %c0_11 = arith.constant 0 : index
    %c0_12 = arith.constant 0 : index
    %c0_13 = arith.constant 0 : index
    %9 = vector.load %arg3[%c0_11, %c0_12, %c0_13] : memref<2x1x640xf32, #tpu.memory_space<vmem>>, vector<1x1x640xf32>
    %10 = vector.shape_cast %9 : vector<1x1x640xf32> to vector<1x640xf32>
    %11 = vector.broadcast %10 : vector<1x640xf32> to vector<8x640xf32>
    %12 = arith.addf %8, %11 : vector<8x640xf32>
    %13 = vector.extract_strided_slice %12 {offsets = [0, 0], sizes = [8, 128], strides = [1, 1]} : vector<8x640xf32> to vector<8x128xf32>
    %cst_14 = arith.constant dense<0xFF800000> : vector<8xf32>
    %14 = vector.multi_reduction <maximumf>, %13, %cst_14 [1] : vector<8x128xf32> to vector<8xf32>
    %15 = vector.shape_cast %14 : vector<8xf32> to vector<8x1xf32>
    %16 = vector.broadcast %15 : vector<8x1xf32> to vector<8x128xf32>
    %17 = arith.cmpf oeq, %13, %16 : vector<8x128xf32>
    %c128_i32 = arith.constant 128 : i32
    %18 = vector.broadcast %c128_i32 : i32 to vector<8x128xi32>
    %19 = arith.select %17, %5, %18 : vector<8x128xi1>, vector<8x128xi32>
    %cst_15 = arith.constant dense<2147483647> : vector<8xi32>
    %20 = vector.multi_reduction <minsi>, %19, %cst_15 [1] : vector<8x128xi32> to vector<8xi32>
    %21 = vector.shape_cast %20 : vector<8xi32> to vector<8x1xi32>
    %22 = vector.extract_strided_slice %12 {offsets = [0, 128], sizes = [8, 128], strides = [1, 1]} : vector<8x640xf32> to vector<8x128xf32>
    %c1_i32 = arith.constant 1 : i32
    %23 = vector.broadcast %c1_i32 : i32 to vector<8x1xi32>
    %24 = arith.cmpi eq, %21, %23 : vector<8x1xi32>
    %25 = vector.extract_strided_slice %12 {offsets = [0, 256], sizes = [8, 128], strides = [1, 1]} : vector<8x640xf32> to vector<8x128xf32>
    %26 = vector.shape_cast %24 : vector<8x1xi1> to vector<8x1xi1>
    %27 = vector.broadcast %26 : vector<8x1xi1> to vector<8x128xi1>
    %28 = arith.select %27, %25, %22 : vector<8x128xi1>, vector<8x128xf32>
    %c2_i32 = arith.constant 2 : i32
    %29 = vector.broadcast %c2_i32 : i32 to vector<8x1xi32>
    %30 = arith.cmpi eq, %21, %29 : vector<8x1xi32>
    %31 = vector.extract_strided_slice %12 {offsets = [0, 384], sizes = [8, 128], strides = [1, 1]} : vector<8x640xf32> to vector<8x128xf32>
    %32 = vector.shape_cast %30 : vector<8x1xi1> to vector<8x1xi1>
    %33 = vector.broadcast %32 : vector<8x1xi1> to vector<8x128xi1>
    %34 = arith.select %33, %31, %28 : vector<8x128xi1>, vector<8x128xf32>
    %c3_i32 = arith.constant 3 : i32
    %35 = vector.broadcast %c3_i32 : i32 to vector<8x1xi32>
    %36 = arith.cmpi eq, %21, %35 : vector<8x1xi32>
    %37 = vector.extract_strided_slice %12 {offsets = [0, 512], sizes = [8, 128], strides = [1, 1]} : vector<8x640xf32> to vector<8x128xf32>
    %38 = vector.shape_cast %36 : vector<8x1xi1> to vector<8x1xi1>
    %39 = vector.broadcast %38 : vector<8x1xi1> to vector<8x128xi1>
    %40 = arith.select %39, %37, %34 : vector<8x128xi1>, vector<8x128xf32>
    %41 = arith.truncf %40 : vector<8x128xf32> to vector<8x128xbf16>
    %c1 = arith.constant 1 : index
    %c0_16 = arith.constant 0 : index
    %c0_17 = arith.constant 0 : index
    %42 = vector.load %arg2[%c1, %c0_16, %c0_17] : memref<2x128x640xbf16, #tpu.memory_space<vmem>>, vector<1x128x640xbf16>
    %43 = vector.shape_cast %42 : vector<1x128x640xbf16> to vector<128x640xbf16>
    %cst_18 = arith.constant dense<0.000000e+00> : vector<8x640xf32>
    %44 = tpu.matmul %41, %43, %cst_18 {dimension_numbers = #tpu.dot_dimension_numbers<[1], [0], [0], [1], [0, 0, 1, 1], [], []>} : vector<8x128xbf16>, vector<128x640xbf16>, vector<8x640xf32> -> vector<8x640xf32>
    %c1_19 = arith.constant 1 : index
    %c0_20 = arith.constant 0 : index
    %c0_21 = arith.constant 0 : index
    %45 = vector.load %arg3[%c1_19, %c0_20, %c0_21] : memref<2x1x640xf32, #tpu.memory_space<vmem>>, vector<1x1x640xf32>
    %46 = vector.shape_cast %45 : vector<1x1x640xf32> to vector<1x640xf32>
    %47 = vector.broadcast %46 : vector<1x640xf32> to vector<8x640xf32>
    %48 = arith.addf %44, %47 : vector<8x640xf32>
    %49 = vector.extract_strided_slice %48 {offsets = [0, 0], sizes = [8, 128], strides = [1, 1]} : vector<8x640xf32> to vector<8x128xf32>
    %cst_22 = arith.constant dense<0xFF800000> : vector<8xf32>
    %50 = vector.multi_reduction <maximumf>, %49, %cst_22 [1] : vector<8x128xf32> to vector<8xf32>
    %51 = vector.shape_cast %50 : vector<8xf32> to vector<8x1xf32>
    %52 = vector.broadcast %51 : vector<8x1xf32> to vector<8x128xf32>
    %53 = arith.cmpf oeq, %49, %52 : vector<8x128xf32>
    %c128_i32_23 = arith.constant 128 : i32
    %54 = vector.broadcast %c128_i32_23 : i32 to vector<8x128xi32>
    %55 = arith.select %53, %5, %54 : vector<8x128xi1>, vector<8x128xi32>
    %cst_24 = arith.constant dense<2147483647> : vector<8xi32>
    %56 = vector.multi_reduction <minsi>, %55, %cst_24 [1] : vector<8x128xi32> to vector<8xi32>
    %57 = vector.shape_cast %56 : vector<8xi32> to vector<8x1xi32>
    %58 = vector.extract_strided_slice %48 {offsets = [0, 128], sizes = [8, 128], strides = [1, 1]} : vector<8x640xf32> to vector<8x128xf32>
    %c1_i32_25 = arith.constant 1 : i32
    %59 = vector.broadcast %c1_i32_25 : i32 to vector<8x1xi32>
    %60 = arith.cmpi eq, %57, %59 : vector<8x1xi32>
    %61 = vector.extract_strided_slice %48 {offsets = [0, 256], sizes = [8, 128], strides = [1, 1]} : vector<8x640xf32> to vector<8x128xf32>
    %62 = vector.shape_cast %60 : vector<8x1xi1> to vector<8x1xi1>
    %63 = vector.broadcast %62 : vector<8x1xi1> to vector<8x128xi1>
    %64 = arith.select %63, %61, %58 : vector<8x128xi1>, vector<8x128xf32>
    %c2_i32_26 = arith.constant 2 : i32
    %65 = vector.broadcast %c2_i32_26 : i32 to vector<8x1xi32>
    %66 = arith.cmpi eq, %57, %65 : vector<8x1xi32>
    %67 = vector.extract_strided_slice %48 {offsets = [0, 384], sizes = [8, 128], strides = [1, 1]} : vector<8x640xf32> to vector<8x128xf32>
    %68 = vector.shape_cast %66 : vector<8x1xi1> to vector<8x1xi1>
    %69 = vector.broadcast %68 : vector<8x1xi1> to vector<8x128xi1>
    %70 = arith.select %69, %67, %64 : vector<8x128xi1>, vector<8x128xf32>
    %c3_i32_27 = arith.constant 3 : i32
    %71 = vector.broadcast %c3_i32_27 : i32 to vector<8x1xi32>
    %72 = arith.cmpi eq, %57, %71 : vector<8x1xi32>
    %73 = vector.extract_strided_slice %48 {offsets = [0, 512], sizes = [8, 128], strides = [1, 1]} : vector<8x640xf32> to vector<8x128xf32>
    %74 = vector.shape_cast %72 : vector<8x1xi1> to vector<8x1xi1>
    %75 = vector.broadcast %74 : vector<8x1xi1> to vector<8x128xi1>
    %76 = arith.select %75, %73, %70 : vector<8x128xi1>, vector<8x128xf32>
    %77 = arith.truncf %76 : vector<8x128xf32> to vector<8x128xbf16>
    %c0_28 = arith.constant 0 : index
    %c0_29 = arith.constant 0 : index
    %78 = vector.load %arg4[%c0_28, %c0_29] : memref<128x128xbf16, #tpu.memory_space<vmem>>, vector<128x128xbf16>
    %cst_30 = arith.constant dense<0.000000e+00> : vector<8x128xf32>
    %79 = tpu.matmul %77, %78, %cst_30 {dimension_numbers = #tpu.dot_dimension_numbers<[1], [0], [0], [1], [0, 0, 1, 1], [], []>} : vector<8x128xbf16>, vector<128x128xbf16>, vector<8x128xf32> -> vector<8x128xf32>
    %c0_31 = arith.constant 0 : index
    %c0_32 = arith.constant 0 : index
    %80 = vector.load %arg5[%c0_31, %c0_32] : memref<1x128xf32, #tpu.memory_space<vmem>>, vector<1x128xf32>
    %81 = vector.broadcast %80 : vector<1x128xf32> to vector<8x128xf32>
    %82 = arith.addf %79, %81 : vector<8x128xf32>
    %c0_33 = arith.constant 0 : index
    %c0_34 = arith.constant 0 : index
    %83 = vector.load %arg6[%c0_33, %c0_34] : memref<8x128xf32, #tpu.memory_space<vmem>>, vector<8x128xf32>
    tpu.vector_store %arg6[%c0_33, %c0_34], %82 {strides = array<i32>} : memref<8x128xf32, #tpu.memory_space<vmem>>, vector<8x128xf32>,
    return
  }
  func.func @transform_0(%arg0: i32) -> (i32, i32) {
    %c0_i32 = arith.constant 0 : i32
    %c0_i32_0 = arith.constant 0 : i32
    return %arg0, %c0_i32 : i32, i32
  }
  func.func @transform_1(%arg0: i32) -> (i32, i32, i32) {
    %c0_i32 = arith.constant 0 : i32
    %c0_i32_0 = arith.constant 0 : i32
    %c0_i32_1 = arith.constant 0 : i32
    %c0_i32_2 = arith.constant 0 : i32
    return %c0_i32, %c0_i32_0, %c0_i32_1 : i32, i32, i32
  }
  func.func @transform_2(%arg0: i32) -> (i32, i32, i32) {
    %c0_i32 = arith.constant 0 : i32
    %c0_i32_0 = arith.constant 0 : i32
    %c0_i32_1 = arith.constant 0 : i32
    %c0_i32_2 = arith.constant 0 : i32
    return %c0_i32, %c0_i32_0, %c0_i32_1 : i32, i32, i32
  }
  func.func @transform_3(%arg0: i32) -> (i32, i32) {
    %c0_i32 = arith.constant 0 : i32
    %c0_i32_0 = arith.constant 0 : i32
    %c0_i32_1 = arith.constant 0 : i32
    return %c0_i32, %c0_i32_0 : i32, i32
  }
  func.func @transform_4(%arg0: i32) -> (i32, i32) {
    %c0_i32 = arith.constant 0 : i32
    %c0_i32_0 = arith.constant 0 : i32
    %c0_i32_1 = arith.constant 0 : i32
    return %c0_i32, %c0_i32_0 : i32, i32
  }
  func.func @transform_5(%arg0: i32) -> (i32, i32) {
    %c0_i32 = arith.constant 0 : i32
    %c0_i32_0 = arith.constant 0 : i32
    return %arg0, %c0_i32 : i32, i32
  }
}

</mosaic_0001>

<bundles_post_ra>
// kernel: tpu_custom_call.1
= control target key start
LH: loop header
LB: loop body
LE: loop exit
PB: predicated region body
PF: predicated region fallthrough
CT: control target
= control target key end

     0   :  { %10 = vsyncpa [#allocation4], 0  ;;  %s2367_s0 = inlined_call_operand.hbm [shape: bf16[16,32], index: 0, kind: input, shape index: {}]   ;;  %s2368_s1 = inlined_call_operand.hbm [shape: bf16[2,128,640], index: 1, kind: input, shape index: {}]   ;;  %s2369_s2 = inlined_call_operand.hbm [shape: f32[2,1,640], index: 2, kind: input, shape index: {}]   ;;  %s2370_s3 = inlined_call_operand.hbm [shape: bf16[128,128], index: 3, kind: input, shape index: {}]   ;;  %s2371_s4 = inlined_call_operand.vmem [shape: f32[1,128], index: 4, kind: input, shape index: {}]   ;;  %s2372_s5 = inlined_call_operand.hbm [shape: f32[16,128], index: 5, kind: output, shape index: {}]  }
   0x1   :  { %12 = vsyncpa [#allocation4 + $0x1], 0 }
   0x2   :  { %13 = vsyncpa [#allocation7], 0 }
   0x3   :  { %14 = vsyncpa [#allocation10], 0 }
   0x4   :  { %15 = vsyncpa [#allocation5], 0 }
   0x5   :  { %17 = vsyncpa [#allocation5 + $0x1], 0  ;;  %s2025_s18 = smov 0   ;;  %s2027_s19 = smov 0  }
   0x6   :  { %s2029_s20 = smov 0   ;;  %s2031_s21 = smov 0  }
   0x7 LB: > { %s2046_s22 = sadd.s32 4294967295, %s1979_s21   ;;  %s1391_s23 = sadd.s32 4294967294, %s1979_s21   ;;  %s1979_s21 = sphi %s2031_s21, %s2395_s21   ;;  %s1975_s20 = sphi %s2029_s20, %s2394_s20   ;;  %s1971_s19 = sphi %s2027_s19, %s2393_s19   ;;  %s1967_s18 = sphi %s2025_s18, %s2392_s18  }
   0x8   : > { %p43_p0 = scmp.ne.s32.totalorder %s1971_s19, %s1967_s18  ;;  %p2373_p1 = scmp.eq.s32.totalorder %s2046_s22, 0 }
   0x9   : > { %p157_p3 = scmp.eq.s32.totalorder %s1391_s23, 1  ;;  %p1392_p5 = scmp.ge.s32.totalorder %s1979_s21, 1 }
   0xa   : > { %p2055_p4 = por %p2373_p1, %p43_p0  ;;  %p164_p7 = scmp.lt.s32.totalorder %s1979_s21, 3 }
   0xb   : > { %p2060_p6 = por %p157_p3, %p43_p0  ;;  %s1981_s27 = smov [#allocation6]  }
   0xc   : > { %s2376_s24 = scalar_select %p2055_p4, 1, 0 }
   0xd   : > { %s2377_s25 = scalar_select %p2060_p6, 1, 0 }
   0xe   : > { %p2065_p8 = pnand %p1392_p5, %p164_p7  ;;  %s176_s28 = sshll.u32 %s1981_s27, 4  ;;  %s2069_s28 = int_to_ptr.vmem [resolvable:$true] %s176_s28 }
   0xf   : > { %s1982_s30 = smov [#allocation8]   ;;  %s1791_s9 = scalar_lea.hbm %s2368_s1, 10240 }
  0x10   : > { %s2378_s26 = scalar_select %p2065_p8, 1, 0 }
  0x11   : > { %p1601_p9 = pneg %p2065_p8  ;;  %s189_s6 = sshll.u32 %s1982_s30, 4  ;;  %s2080_s6 = int_to_ptr.vmem [resolvable:$true] %s189_s6 }
  0x12   : > { %p1792_p12 = scmp.ne.s32.totalorder %s2368_s1, %s1791_s9  ;;  %p1798_p5 = scmp.lt.u32.totalorder %s1791_s9, %s2368_s1 }
  0x13   : > { %p2076_p11 = pnand %p1601_p9, %p2373_p1 }
  0x15   : > { %p2090_p13 = pneg %p2076_p11 }
  0x17   : > { %p1794_p0 = pnand %p2090_p13, %p1792_p12 }
  0x19   : > { %p1795_p3 = pneg %p1794_p0 }
  0x1b   : > { %p1800_p7 = pnand %p1798_p5, %p1795_p3 }
  0x1d   : > { %1803 = shalt.err (!%p1800_p7)
}
  0x1e   : > { %s1804_s15 = scalar_lea.vmem %s2069_s28, 10240  ;;  %p1812_p2 = scmp.lt.s32.totalorder %s2069_s28, %s2069_s28 }
  0x1f   : > { %p1805_p9 = scmp.ne.s32.totalorder %s2069_s28, %s1804_s15  ;;  %p1813_p6 = scmp.lt.s32.totalorder %s1804_s15, %s1804_s15 }
  0x21   : > { %p1807_p10 = pnand %p1805_p9, %p2090_p13  ;;  %p1814_p12 = por %p1813_p6, %p1812_p2 }
  0x23   : > { %p1808_p1 = pneg %p1807_p10 }
  0x25   : > { %p1815_p0 = pnand %p1814_p12, %p1808_p1 }
  0x27   : > { %1818 = shalt.err (!%p1815_p0)
}
  0x28   : > { %s1983_s16 = smov 320   ;;  %s1984_s17 = smov 20  }
  0x29   : > { %1604 = dma.hbm_to_vmem [thread:$0]  (!%p2076_p11), %s2368_s1, 10240, %s2069_s28, [#allocation7], %s1983_s16, %s1983_s16, %s1984_s17  }
  0x2a   : > { %s1819_s8 = scalar_lea.hbm %s2369_s2, 160 }
  0x2b   : > { %p1820_p2 = scmp.ne.s32.totalorder %s2369_s2, %s1819_s8  ;;  %p1826_p10 = scmp.lt.u32.totalorder %s1819_s8, %s2369_s2 }
  0x2d   : > { %p1822_p1 = pnand %p1820_p2, %p2090_p13 }
  0x2f   : > { %p1823_p6 = pneg %p1822_p1 }
  0x31   : > { %p1828_p3 = pnand %p1826_p10, %p1823_p6 }
  0x33   : > { %1831 = shalt.err (!%p1828_p3)
}
  0x34   : > { %s1832_s28 = scalar_lea.vmem %s2080_s6, 160  ;;  %p1840_p12 = scmp.lt.s32.totalorder %s2080_s6, %s2080_s6 }
  0x35   : > { %p1833_p5 = scmp.ne.s32.totalorder %s2080_s6, %s1832_s28  ;;  %p1841_p0 = scmp.lt.s32.totalorder %s1832_s28, %s1832_s28 }
  0x37   : > { %p1835_p7 = pnand %p1833_p5, %p2090_p13  ;;  %p1842_p2 = por %p1841_p0, %p1840_p12 }
  0x39   : > { %p1836_p9 = pneg %p1835_p7 }
  0x3b   : > { %p1843_p1 = pnand %p1842_p2, %p1836_p9 }
  0x3d   : > { %1846 = shalt.err (!%p1843_p1)
}
  0x3e   : > { %s1985_s14 = smov 80   ;;  %s1986_s15 = smov 5  }
  0x3f   : > { %1607 = dma.hbm_to_vmem [thread:$0]  (!%p2076_p11), %s2369_s2, 160, %s2080_s6, [#allocation7], %s1985_s14, %s1985_s14, %s1986_s15  }
  0x40   : > { %s1987_s23 = smov [#allocation9]   ;;  %s1847_s8 = scalar_lea.hbm %s2370_s3, 1024 }
  0x41   : > { %s202_s27 = sshll.u32 %s1987_s23, 4  ;;  %p1848_p6 = scmp.ne.s32.totalorder %s2370_s3, %s1847_s8  ;;  %s203_s27 = int_to_ptr.vmem [resolvable:$true] %s202_s27 }
  0x42   : > { %p1854_p5 = scmp.lt.u32.totalorder %s1847_s8, %s2370_s3 }
  0x43   : > { %p1850_p10 = pnand %p1848_p6, %p2090_p13 }
  0x45   : > { %p1851_p3 = pneg %p1850_p10 }
  0x47   : > { %p1856_p7 = pnand %p1854_p5, %p1851_p3 }
  0x49   : > { %1859 = shalt.err (!%p1856_p7)
}
  0x4a   : > { %s1860_s6 = scalar_lea.vmem %s203_s27, 1024  ;;  %p1868_p2 = scmp.lt.s32.totalorder %s203_s27, %s203_s27 }
  0x4b   : > { %p1861_p9 = scmp.ne.s32.totalorder %s203_s27, %s1860_s6  ;;  %p1869_p1 = scmp.lt.s32.totalorder %s1860_s6, %s1860_s6 }
  0x4d   : > { %p1863_p12 = pnand %p1861_p9, %p2090_p13  ;;  %p1870_p4 = por %p1869_p1, %p1868_p2 }
  0x4f   : > { %p1864_p0 = pneg %p1863_p12 }
  0x51   : > { %p1871_p8 = pnand %p1870_p4, %p1864_p0 }
  0x53   : > { %1874 = shalt.err (!%p1871_p8)
}
  0x54   : > { %s1988_s28 = smov 64   ;;  %s1989_s12 = smov 4  }
  0x55   : > { %1610 = dma.hbm_to_vmem [thread:$0]  (!%p2076_p11), %s2370_s3, 1024, %s203_s27, [#allocation10], %s1988_s28, %s1988_s28, %s1989_s12  }
  0x56   : > { %s2153_s16 = sadd.s32 1, %s1979_s21   ;;  %s30_s23 = sadd.s32 1, %s1975_s20 }
  0x57   : > { %s27_s17 = ssub.s32 %s1979_s21, %s2153_s16  ;;  %p37_p8 = scmp.ne.s32.totalorder %s1975_s20, %s1971_s19 }
  0x58   : > { %p28_p4 = scmp.eq.s32.totalorder %s27_s17, 0  ;;  %p38_p13 = scmp.eq.s32.totalorder %s1979_s21, 0 }
  0x59   : > { %p1622_p6 = scmp.lt.s32.totalorder %s1979_s21, 2  ;;  %p2381_p3 = scmp.eq.s32.totalorder %s2046_s22, 1 }
  0x5a   : > { %s2163_s30 = scalar_select %p28_p4, %s1975_s20, %s30_s23  }
  0x5b   : > { %p39_p10 = por %p38_p13, %p37_p8  ;;  %p2167_p5 = por %p2381_p3, %p37_p8 }
  0x5c   : > { %s219_s29 = sand.u32 1, %s1975_s20   ;;  %s1398_s8 = sshll.u32 %s1979_s21, 6 }
  0x5d   : > { %s1397_s27 = sshll.u32 %s219_s29, 2  ;;  %s2176_s11 = scalar_lea.hbm %s2367_s0, %s1398_s8 }
  0x5e   : > { %s223_s13 = scalar_lea.vmem [#allocation3], %s1397_s27  ;;  %p2178_p11 = pnand %p1622_p6, %p39_p10 }
  0x5f   : > { %s230_s6 = sshll.u32 %s223_s13, 4  ;;  %s220_s12 = scalar_lea.sflag [#allocation4], %s219_s29  ;;  %s2182_s6 = int_to_ptr.vmem [resolvable:$true] %s230_s6 }
  0x60   : > { %s1875_s14 = scalar_lea.hbm %s2176_s11, 64  ;;  %p1877_p9 = pneg %p2178_p11 }
  0x61   : > { %p1876_p7 = scmp.ne.s32.totalorder %s2176_s11, %s1875_s14  ;;  %s1880_s23 = scalar_lea.hbm %s2367_s0, 128 }
  0x62   : > { %p1881_p2 = scmp.lt.u32.totalorder %s2176_s11, %s2367_s0  ;;  %p1882_p1 = scmp.lt.u32.totalorder %s1880_s23, %s1875_s14 }
  0x63   : > { %p1878_p12 = pnand %p1877_p9, %p1876_p7  ;;  %p1884_p8 = scmp.lt.u32.totalorder %s1875_s14, %s2176_s11 }
  0x64   : > { %p1883_p4 = por %p1882_p1, %p1881_p2 }
  0x65   : > { %p1879_p0 = pneg %p1878_p12 }
  0x66   : > { %p1885_p13 = por %p1884_p8, %p1883_p4 }
  0x68   : > { %p1886_p6 = pnand %p1885_p13, %p1879_p0 }
  0x6a   : > { %1889 = shalt.err (!%p1886_p6)
}
  0x6b   : > { %s1890_s29 = scalar_lea.vmem %s2182_s6, 64  ;;  %s1990_s9 = smov [#allocation3]  }
  0x6c   : > { %p1891_p10 = scmp.ne.s32.totalorder %s2182_s6, %s1890_s29  ;;  %s1895_s10 = sshll.u32 %s1990_s9, 4  ;;  %s1896_s10 = int_to_ptr.vmem [resolvable:$false] %s1895_s10 }
  0x6d   : > { %s1897_s13 = scalar_lea.vmem %s1896_s10, 128  ;;  %p1898_p12 = scmp.lt.s32.totalorder %s2182_s6, %s1896_s10 }
  0x6e   : > { %p1893_p3 = pnand %p1891_p10, %p1877_p9  ;;  %p1899_p2 = scmp.lt.s32.totalorder %s1897_s13, %s1890_s29 }
  0x70   : > { %p1894_p7 = pneg %p1893_p3  ;;  %p1900_p1 = por %p1899_p2, %p1898_p12 }
  0x72   : > { %p1901_p4 = pnand %p1900_p1, %p1894_p7 }
  0x74   : > { %1904 = shalt.err (!%p1901_p4)
}
  0x75   : > { %1614 = dma.hbm_to_vmem [thread:$0]  (!%p2178_p11), %s2176_s11, 64, %s2182_s6, %s220_s12  }
  0x76   : > { %p2384_p0 = scmp.ne.s32.totalorder %s2378_s26, 0 }
  0x77   : > { %s2212_s14 = sand.u32 (!%p2384_p0), 1, %s1971_s19   ;;  %p2385_p9 = scmp.ne.s32.totalorder (!%p2384_p0), %s2376_s24, 0 }
  0x78   : > { %239 = sbr.rel (%p2384_p0) target bundleno = 1712 (0x6b0), region = 40  ;;  %s1400_s15 = sshll.u32 (!%p2384_p0), %s2212_s14, 2 }
  0x79   : > { %s242_s17 = scalar_lea.sflag (!%p2384_p0), [#allocation4], %s2212_s14  ;;  %s245_s23 = scalar_lea.vmem (!%p2384_p0), [#allocation3], %s1400_s15 }
  0x7f   : > { %1950 = dma.done.wait (%p2385_p9), %s242_s17, 64  }
  0x80   : > { %1952 = vsyncadd (%p2385_p9), %s242_s17, 4294967232  ;;  %p2386_p8 = scmp.eq.s32.totalorder %s2046_s22, 0 }
  0x82   : > { %1954 = dma.done.wait (%p2386_p8), [#allocation7], 10400   ;;  %p2387_p11 = pmov %p2386_p8 }
  0x83   : > { %p2388_p13 = pmov %p2386_p8 }
  0x84   : > { %1956 = vsyncadd (%p2387_p11), [#allocation7], 4294956896 }
  0x85   : > { %1958 = dma.done.wait (%p2388_p13), [#allocation10], 1024   ;;  %p2389_p6 = pmov %p2386_p8 }
  0x86   : > { %v1991_v0 = vmov 0   ;;  %v1671_v1 = vld [vmem:[#allocation6 + $0x4] ss:$20 sps:$4 sm:$0xff]   ;;  %v1673_v2 = vld [vmem:[#allocation6] ss:$20 sps:$4 sm:$0xff]   ;;  %vm287_vm0 = vcmask 257024   ;;  %v290_v19 = vlaneseq }
  0x87   : > { %1960 = vsyncadd (%p2389_p6), [#allocation10], 4294966272  ;;  %285 = vst [vmem:[#allocation2] sm:$0xf] %v1991_v0  ;;  %607 = vmatprep.mubr.bf16.mxu0 %v1991_v0  ;;  %648 = vmatprep.mubr.bf16.mxu1 %v1991_v0  ;;  %v1674_v3 = vld [vmem:[#allocation6 + $0x2c] ss:$20 sps:$4 sm:$0xff]  }
  0x88   : > { %575 = vmatprep.subr.bf16.mxu0 %v1671_v1  ;;  %v1676_v4 = vld [vmem:[#allocation6 + $0x28] ss:$20 sps:$4 sm:$0xff]   ;;  %v1679_v6 = vld [vmem:[#allocation6 + $0x50] ss:$20 sps:$4 sm:$0xff]   ;;  %v1682_v8 = vld [vmem:[#allocation6 + $0x78] ss:$20 sps:$4 sm:$0xff]  }
  0x89   : > { %576 = vmatpush1.bf16.msra.mxu0 %v1673_v2  ;;  %v1677_v5 = vld [vmem:[#allocation6 + $0x54] ss:$20 sps:$4 sm:$0xff]   ;;  %v1680_v7 = vld [vmem:[#allocation6 + $0x7c] ss:$20 sps:$4 sm:$0xff]   ;;  %v1683_v10 = vld [vmem:[#allocation6 + $0xa4] ss:$20 sps:$4 sm:$0xff]  }
  0x8a   : > { %577 = vmatprep.subr.bf16.mxu0 %v1674_v3  ;;  %v286_v9 = vld [vmem:[%s245_s23] sm:$0xf]  ;;  %v1685_v11 = vld [vmem:[#allocation6 + $0xa0] ss:$20 sps:$4 sm:$0xff]   ;;  %v1691_v15 = vld [vmem:[#allocation6 + $0xf0] ss:$20 sps:$4 sm:$0xff]  }
  0x8b   : > { %288 = vst.msk [vmem:[#allocation2] sm:$0xf] %vm287_vm0, %v286_v9  ;;  %v1686_v12 = vld [vmem:[#allocation6 + $0xcc] ss:$20 sps:$4 sm:$0xff]   ;;  %v1688_v13 = vld [vmem:[#allocation6 + $0xc8] ss:$20 sps:$4 sm:$0xff]  }
  0x8c   : > { %v1689_v14 = vld [vmem:[#allocation6 + $0xf4] ss:$20 sps:$4 sm:$0xff]   ;;  %v1692_v16 = vld [vmem:[#allocation6 + $0x11c] ss:$20 sps:$4 sm:$0xff]   ;;  %v1694_v17 = vld [vmem:[#allocation6 + $0x118] ss:$20 sps:$4 sm:$0xff]  }
  0x8d   : > { %578 = vmatpush1.bf16.msra.mxu0 %v1676_v4  ;;  %v2235_v20 = vshrl.u32 %v290_v19, 7  ;;  %v2238_v22 = vld [vmem:[#allocation8] sm:$0x1f]  ;;  %v1697_v30 = vld [vmem:[#allocation6 + $0x8] ss:$20 sps:$4 sm:$0xff]   ;;  %v1992_v31 = vmov 0.0  }
  0x8e   : > { %579 = vmatprep.subr.bf16.mxu0 %v1677_v5  ;;  %v1695_v29 = vld [vmem:[#allocation6 + $0xc] ss:$20 sps:$4 sm:$0xff]   ;;  %v1698_v32 = vld [vmem:[#allocation6 + $0x10] ss:$20 sps:$4 sm:$0xff]   ;;  %v1699_v33 = vld [vmem:[#allocation6 + $0x34] ss:$20 sps:$4 sm:$0xff]  }
  0x8f   : > { %v344_v21 = vsub.s32 0, %v2235_v20  ;;  %vm1993_vm1 = vmmov 0   ;;  %616 = vmatprep.subr.bf16.mxu1 %v1695_v29  ;;  %v1701_v34 = vld [vmem:[#allocation6 + $0x30] ss:$20 sps:$4 sm:$0xff]   ;;  %v1702_v35 = vld [vmem:[#allocation6 + $0x38] ss:$20 sps:$4 sm:$0xff]  }
  0x90   : > { %617 = vmatpush1.bf16.msra.mxu1 %v1697_v30  ;;  %v1703_v36 = vld [vmem:[#allocation6 + $0x5c] ss:$20 sps:$4 sm:$0xff]   ;;  %v1705_v37 = vld [vmem:[#allocation6 + $0x58] ss:$20 sps:$4 sm:$0xff]   ;;  %v1706_v38 = vld [vmem:[#allocation6 + $0x60] ss:$20 sps:$4 sm:$0xff]  }
  0x91   : > { %580 = vmatpush1.bf16.msra.mxu0 %v1679_v6  ;;  %v345_v23 = vrot.slane %v2238_v22, %v344_v21  ;;  %618 = vmatprep.subr.bf16.mxu1 %v1699_v33  ;;  %v1707_v39 = vld [vmem:[#allocation6 + $0x84] ss:$20 sps:$4 sm:$0xff]   ;;  %v1709_v40 = vld [vmem:[#allocation6 + $0x80] ss:$20 sps:$4 sm:$0xff]   ;;  %v1710_v41 = vld [vmem:[#allocation6 + $0x88] ss:$20 sps:$4 sm:$0xff]  }
  0x92   : > { %581 = vmatprep.subr.bf16.mxu0 %v1680_v7  ;;  %v2231_v18 = vld [vmem:[#allocation2] sm:$0xf]  ;;  %v1711_v42 = vld [vmem:[#allocation6 + $0xac] ss:$20 sps:$4 sm:$0xff]   ;;  %v1713_v43 = vld [vmem:[#allocation6 + $0xa8] ss:$20 sps:$4 sm:$0xff]  }
  0x93   : > { %v1714_v44 = vld [vmem:[#allocation6 + $0xb0] ss:$20 sps:$4 sm:$0xff]   ;;  %v1715_v45 = vld [vmem:[#allocation6 + $0xd4] ss:$20 sps:$4 sm:$0xff]   ;;  %v1718_v47 = vld [vmem:[#allocation6 + $0xd8] ss:$20 sps:$4 sm:$0xff]  }
  0x94   : > { %619 = vmatpush1.bf16.msra.mxu1 %v1701_v34  ;;  %v1717_v46 = vld [vmem:[#allocation6 + $0xd0] ss:$20 sps:$4 sm:$0xff]   ;;  %v1721_v49 = vld [vmem:[#allocation6 + $0xf8] ss:$20 sps:$4 sm:$0xff]   ;;  %v1722_v50 = vld [vmem:[#allocation6 + $0x100] ss:$20 sps:$4 sm:$0xff]  }
  0x95   : > { %582 = vmatpush1.bf16.msra.mxu0 %v1682_v8  ;;  %620 = vmatprep.subr.bf16.mxu1 %v1703_v36  ;;  %v1719_v48 = vld [vmem:[#allocation6 + $0xfc] ss:$20 sps:$4 sm:$0xff]   ;;  %v1723_v51 = vld [vmem:[#allocation6 + $0x124] ss:$20 sps:$4 sm:$0xff]   ;;  %v1725_v52 = vld [vmem:[#allocation6 + $0x120] ss:$20 sps:$4 sm:$0xff]  }
  0x96   : > { %583 = vmatprep.subr.bf16.mxu0 %v1683_v10  ;;  %v1726_v53 = vld [vmem:[#allocation6 + $0x128] ss:$20 sps:$4 sm:$0xff]   ;;  %v2263_v54 = vand.u32 127, %v290_v19  ;;  %v1727_v59 = vld [vmem:[#allocation6 + $0x140] ss:$20 sps:$4 sm:$0xff]   ;;  %s1404_s24 = sshll.u32 %s2212_s14, 3 }
  0x97   : > { %v1729_v60 = vld [vmem:[#allocation6 + $0x144] ss:$20 sps:$4 sm:$0xff]   ;;  %v1730_v61 = vld [vmem:[#allocation6 + $0x148] ss:$20 sps:$4 sm:$0xff]   ;;  %v1732_v62 = vld [vmem:[#allocation6 + $0x14c] ss:$20 sps:$4 sm:$0xff]  }
  0x98   : > { %621 = vmatpush1.bf16.msra.mxu1 %v1705_v37  ;;  %v1735_v63 = vld [vmem:[#allocation6 + $0x16c] ss:$20 sps:$4 sm:$0xff]   ;;  %v1738_v1 = vld [vmem:[#allocation6 + $0x174] ss:$20 sps:$4 sm:$0xff]   ;;  %v1736_v2 = vld [vmem:[#allocation6 + $0x170] ss:$20 sps:$4 sm:$0xff]  }
  0x99   : > { %584 = vmatpush1.bf16.msra.mxu0 %v1685_v11  ;;  %622 = vmatprep.subr.bf16.mxu1 %v1707_v39  ;;  %v1741_v3 = vld [vmem:[#allocation6 + $0x194] ss:$20 sps:$4 sm:$0xff]   ;;  %v1744_v4 = vld [vmem:[#allocation6 + $0x19c] ss:$20 sps:$4 sm:$0xff]   ;;  %v1742_v6 = vld [vmem:[#allocation6 + $0x198] ss:$20 sps:$4 sm:$0xff]  }
  0x9a   : > { %585 = vmatprep.subr.bf16.mxu0 %v1686_v12  ;;  %v1739_v5 = vld [vmem:[#allocation6 + $0x190] ss:$20 sps:$4 sm:$0xff]   ;;  %v1745_v9 = vld [vmem:[#allocation6 + $0x1b8] ss:$20 sps:$4 sm:$0xff]   ;;  %v1748_v10 = vld [vmem:[#allocation6 + $0x1c0] ss:$20 sps:$4 sm:$0xff]  }
  0x9b   : > { %v1747_v7 = vld [vmem:[#allocation6 + $0x1bc] ss:$20 sps:$4 sm:$0xff]   ;;  %v1750_v8 = vld [vmem:[#allocation6 + $0x1c4] ss:$20 sps:$4 sm:$0xff]   ;;  %v1756_v12 = vld [vmem:[#allocation6 + $0x1ec] ss:$20 sps:$4 sm:$0xff]  }
  0x9c   : > { %623 = vmatpush1.bf16.msra.mxu1 %v1709_v40  ;;  %v1753_v11 = vld [vmem:[#allocation6 + $0x1e4] ss:$20 sps:$4 sm:$0xff]   ;;  %v1771_v39 = vld [vmem:[#allocation6 + $0x25c] ss:$20 sps:$4 sm:$0xff]   ;;  %s1495_s6 = sshll.u32 %s2046_s22, 7  ;;  %s283_s28 = scalar_lea.vmem [#allocation11], %s1404_s24 }
  0x9d   : > { %586 = vmatpush1.bf16.msra.mxu0 %v1688_v13  ;;  %624 = vmatprep.subr.bf16.mxu1 %v1711_v42  ;;  %v1751_v13 = vld [vmem:[#allocation6 + $0x1e0] ss:$20 sps:$4 sm:$0xff]   ;;  %v1763_v30 = vld [vmem:[#allocation6 + $0x230] ss:$20 sps:$4 sm:$0xff]   ;;  %s1292_s12 = sshll.u32 %s283_s28, 4  ;;  %s2323_s29 = scalar_lea.hbm %s2372_s5, %s1495_s6  ;;  %s2325_s12 = int_to_ptr.vmem [resolvable:$true] %s1292_s12 }
  0x9e   : > { %587 = vmatprep.subr.bf16.mxu0 %v1689_v14  ;;  %v1754_v14 = vld [vmem:[#allocation6 + $0x1e8] ss:$20 sps:$4 sm:$0xff]   ;;  %v1774_v42 = vld [vmem:[#allocation6 + $0x264] ss:$20 sps:$4 sm:$0xff]   ;;  %s1279_s9 = scalar_lea.sflag [#allocation5], %s2212_s14  ;;  %s1905_s22 = scalar_lea.vmem %s2325_s12, 128 }
  0x9f   : > { %p1906_p10 = scmp.ne.s32.totalorder %s2325_s12, %s1905_s22  ;;  %s1994_s10 = smov [#allocation11]  }
  0xa0   : > { %625 = vmatpush1.bf16.msra.mxu1 %v1713_v43  ;;  %v1772_v43 = vld [vmem:[#allocation6 + $0x260] ss:$20 sps:$4 sm:$0xff]   ;;  %s1909_s13 = sshll.u32 %s1994_s10, 4  ;;  %s1910_s13 = int_to_ptr.vmem [resolvable:$false] %s1909_s13 }
  0xa1   : > { %588 = vmatpush1.bf16.msra.mxu0 %v1691_v15  ;;  %626 = vmatprep.subr.bf16.mxu1 %v1715_v45  ;;  %v1759_v15 = vld [vmem:[#allocation6 + $0x20c] ss:$20 sps:$4 sm:$0xff]   ;;  %v356_v45 = vsub.s32 3, %v2235_v20  ;;  %p1907_p3 = pnand %p1906_p10, %p2167_p5  ;;  %s1911_s15 = scalar_lea.vmem %s1910_s13, 256 }
  0xa2   : > { %589 = vmatprep.subr.bf16.mxu0 %v1692_v16  ;;  %v1762_v16 = vld [vmem:[#allocation6 + $0x214] ss:$20 sps:$4 sm:$0xff]   ;;  %p1912_p12 = scmp.lt.s32.totalorder %s2325_s12, %s1910_s13  ;;  %p1913_p2 = scmp.lt.s32.totalorder %s1911_s15, %s1905_s22 }
  0xa3   : > { %p1908_p7 = pneg %p1907_p3 }
  0xa4   : > { %627 = vmatpush1.bf16.msra.mxu1 %v1717_v46  ;;  %v348_v46 = vsub.s32 1, %v2235_v20  ;;  %p1914_p1 = por %p1913_p2, %p1912_p12 }
  0xa5   : > { %590 = vmatpush1.bf16.msra.mxu0 %v1694_v17  ;;  %628 = vmatprep.subr.bf16.mxu1 %v1719_v48  ;;  %v1757_v17 = vld [vmem:[#allocation6 + $0x208] ss:$20 sps:$4 sm:$0xff]  }
  0xa6   : > { %1525 = vmatprep.subr.bf16.mxu0 %v1992_v31  ;;  %p1915_p4 = pnand %p1914_p1, %p1908_p7 }
  0xa8   : > { %608 = vmatmul.mubr.bf16.vlgmr.msra.gmra.mrb[0].mxu0 %v2231_v18  ;;  %629 = vmatpush1.bf16.msra.mxu1 %v1721_v49 }
  0xa9   : > { %1541 = vmatprep.mubr.msk.bf16.mxu0 %vm1993_vm1, %v1992_v31  ;;  %1526 = vmatpush3.bf16.msra.mxu0 %v1698_v32  ;;  %v1768_v32 = vld [vmem:[#allocation6 + $0x23c] ss:$20 sps:$4 sm:$0xff]  }
  0xaa   : > { %1527 = vmatprep.subr.bf16.mxu0 %v1992_v31  ;;  %630 = vmatprep.subr.bf16.mxu1 %v1723_v51  ;;  %v349_v51 = vrot.slane %v2238_v22, %v348_v46 }
  0xac   : > { %631 = vmatpush1.bf16.msra.mxu1 %v1725_v52 }
  0xad   : > { %1528 = vmatpush3.bf16.msra.mxu0 %v1702_v35  ;;  %1013 = vmatprep.subr.bf16.mxu1 %v1729_v60  ;;  %v1766_v35 = vld [vmem:[#allocation6 + $0x238] ss:$20 sps:$4 sm:$0xff]  }
  0xae   : > { %1529 = vmatprep.subr.bf16.mxu0 %v1992_v31 }
  0xaf   : > { %649 = vmatmul.mubr.bf16.vlgmr.msra.gmra.mrb[0].mxu1 %v2231_v18 }
  0xb0   : > { %1045 = vmatprep.mubr.bf16.mxu1 %v1991_v0  ;;  %1014 = vmatpush1.bf16.msra.mxu1 %v1727_v59 }
  0xb1   : > { %1530 = vmatpush3.bf16.msra.mxu0 %v1706_v38  ;;  %1015 = vmatprep.subr.bf16.mxu1 %v1735_v63 }
  0xb2   : > { %1531 = vmatprep.subr.bf16.mxu0 %v1992_v31 }
  0xb5   : > { %1532 = vmatpush3.bf16.msra.mxu0 %v1710_v41  ;;  %v1769_v41 = vld [vmem:[#allocation6 + $0x258] ss:$20 sps:$4 sm:$0xff]  }
  0xb6   : > { %1533 = vmatprep.subr.bf16.mxu0 %v1992_v31 }
  0xb9   : > { %1534 = vmatpush3.bf16.msra.mxu0 %v1714_v44  ;;  %v352_v44 = vsub.s32 2, %v2235_v20 }
  0xba   : > { %1535 = vmatprep.subr.bf16.mxu0 %v1992_v31 }
  0xbb   : > { %v353_v49 = vrot.slane %v2238_v22, %v352_v44 }
  0xbd   : > { %1536 = vmatpush3.bf16.msra.mxu0 %v1718_v47  ;;  %v360_v47 = vsub.s32 4, %v2235_v20  ;;  %v1485_v20 = vld [vmem:[%s2371_s4] ss:$0 sm:$0xff] }
  0xbe   : > { %1537 = vmatprep.subr.bf16.mxu0 %v1992_v31 }
  0xc1   : > { %1538 = vmatpush3.bf16.msra.mxu0 %v1722_v50  ;;  %v357_v50 = vrot.slane %v2238_v22, %v356_v45 }
  0xc2   : > { %1539 = vmatprep.subr.bf16.mxu0 %v1992_v31 }
  0xc5   : > { %1540 = vmatpush3.bf16.msra.mxu0 %v1726_v53  ;;  %v361_v53 = vrot.slane %v2238_v22, %v360_v47  ;;  %v1776_v22 = vld [vmem:[#allocation6 + $0x178] ss:$20 sps:$4 sm:$0xff]  }
  0xc6   : > { %1054 = vmatprep.subr.bf16.mxu0 %v1732_v62 }
  0xc8   : > { %1542 = vmatmul.mubr.bf16.vlgmr.msra.gmra.mrb[4].mxu0 %v2231_v18  ;;  %v1760_v18 = vld [vmem:[#allocation6 + $0x210] ss:$20 sps:$4 sm:$0xff]  }
  0xc9   : > { %1086 = vmatprep.mubr.bf16.mxu0 %v1991_v0  ;;  %v1733_v0 = vld [vmem:[#allocation6 + $0x168] ss:$20 sps:$4 sm:$0xff]   ;;  %1055 = vmatpush1.bf16.msra.mxu0 %v1730_v61 }
  0xca   : > { %1056 = vmatprep.subr.bf16.mxu0 %v1738_v1  ;;  %1016 = vmatpush1.bf16.msra.mxu1 %v1733_v0  ;;  %v1775_v0 = vld [vmem:[#allocation6 + $0x150] ss:$20 sps:$4 sm:$0xff]  }
  0xcb   : > { %1017 = vmatprep.subr.bf16.mxu1 %v1741_v3  ;;  %v1778_v3 = vld [vmem:[#allocation6 + $0x1c8] ss:$20 sps:$4 sm:$0xff]  }
  0xcd   : > { %1057 = vmatpush1.bf16.msra.mxu0 %v1736_v2 }
  0xce   : > { %1058 = vmatprep.subr.bf16.mxu0 %v1744_v4  ;;  %1018 = vmatpush1.bf16.msra.mxu1 %v1739_v5  ;;  %v1779_v4 = vld [vmem:[#allocation6 + $0x1f0] ss:$20 sps:$4 sm:$0xff]   ;;  %v1780_v5 = vld [vmem:[#allocation6 + $0x218] ss:$20 sps:$4 sm:$0xff]  }
  0xcf   : > { %1019 = vmatprep.subr.bf16.mxu1 %v1747_v7  ;;  %v1782_v7 = vld [vmem:[#allocation6 + $0x268] ss:$20 sps:$4 sm:$0xff]  }
  0xd1   : > { %1059 = vmatpush1.bf16.msra.mxu0 %v1742_v6  ;;  %v1781_v6 = vld [vmem:[#allocation6 + $0x240] ss:$20 sps:$4 sm:$0xff]  }
  0xd2   : > { %1060 = vmatprep.subr.bf16.mxu0 %v1750_v8  ;;  %1020 = vmatpush1.bf16.msra.mxu1 %v1745_v9  ;;  %v778_v8 = vld [vmem:[#allocation8 + $0x5] sm:$0x1f] }
  0xd3   : > { %1021 = vmatprep.subr.bf16.mxu1 %v1753_v11  ;;  %v783_v9 = vrot.slane %v778_v8, %v344_v21 }
  0xd5   : > { %1061 = vmatpush1.bf16.msra.mxu0 %v1748_v10 }
  0xd6   : > { %1062 = vmatprep.subr.bf16.mxu0 %v1756_v12  ;;  %1022 = vmatpush1.bf16.msra.mxu1 %v1751_v13 }
  0xd7   : > { %1023 = vmatprep.subr.bf16.mxu1 %v1759_v15 }
  0xd9   : > { %1063 = vmatpush1.bf16.msra.mxu0 %v1754_v14 }
  0xda   : > { %1064 = vmatprep.subr.bf16.mxu0 %v1762_v16  ;;  %1024 = vmatpush1.bf16.msra.mxu1 %v1757_v17 }
  0xdd   : > { %1065 = vmatpush1.bf16.msra.mxu0 %v1760_v18 }
  0xde   : > { %1066 = vmatprep.subr.bf16.mxu0 %v1768_v32  ;;  %v1784_v32 = vld [vmem:[#allocation9 + $0x8] sm:$0xff]  }
  0xe1   : > { %1067 = vmatpush1.bf16.msra.mxu0 %v1766_v35  ;;  %v1787_v35 = vld [vmem:[#allocation9 + $0x20] sm:$0xff]  }
  0xe2   : > { %1068 = vmatprep.subr.bf16.mxu0 %v1774_v42 }
  0xe5   : > { %1069 = vmatpush1.bf16.msra.mxu0 %v1772_v43  ;;  %v791_v43 = vrot.slane %v778_v8, %v352_v44 }
  0xe6   : > { %1565 = vmatprep.subr.bf16.mxu0 %v1992_v31 }
 0x17b   : > { %v609_v24 = vpop.f32.mrb[0].mxu0 }
 0x17c   : > { %v2243_v25 = vadd.f32 %v609_v24, %v345_v23  ;;  %v2245_v26 = vpop.f32.mrb[1].mxu0 }
 0x17d   : > { %v613_v27 = vpop.f32.mrb[2].mxu0  ;;  %v612_v60 = vadd.f32 %v2245_v26, %v349_v51  ;;  %v1777_v26 = vld [vmem:[#allocation6 + $0x1a0] ss:$20 sps:$4 sm:$0xff]  }
 0x17e   : > { %v614_v28 = vpop.f32.mrb[3].mxu0  ;;  %697 = vmax.xlane.f32.xlu0 %v2243_v25 }
 0x17f   : > { %v1765_v28 = vld [vmem:[#allocation6 + $0x234] ss:$20 sps:$4 sm:$0xff]  }
 0x180   : > { %1025 = vmatprep.subr.bf16.mxu1 %v1765_v28 }
 0x181   : > { %1026 = vmatpush1.bf16.msra.mxu1 %v1763_v30  ;;  %v1783_v30 = vld [vmem:[#allocation9] sm:$0xff]  }
 0x182   : > { %v650_v19 = vpop.f32.mrb[0].mxu1  ;;  %1027 = vmatprep.subr.bf16.mxu1 %v1771_v39 }
 0x183   : > { %v652_v29 = vpop.f32.mrb[1].mxu1 }
 0x184   : > { %v654_v33 = vpop.f32.mrb[2].mxu1  ;;  %v653_v59 = vadd.f32 %v652_v29, %v357_v50  ;;  %v795_v50 = vrot.slane %v778_v8, %v356_v45 }
 0x185   : > { %v655_v36 = vpop.f32.mrb[3].mxu1  ;;  %1028 = vmatpush1.bf16.msra.mxu1 %v1769_v41  ;;  %v1785_v33 = vld [vmem:[#allocation9 + $0x10] sm:$0xff]   ;;  %v1790_v41 = vld [vmem:[#allocation9 + $0x38] sm:$0xff]  }
 0x186   : > { %1545 = vmatprep.subr.bf16.mxu1 %v1992_v31 }
 0x19b   : > { %v691_v34 = vpop.f32.mrb[4].mxu0 }
 0x19c   : > { %v1543_v37 = vpop.f32.mrb[5].mxu0  ;;  %v692_v61 = vadd.f32 %v691_v34, %v361_v53  ;;  %v1786_v34 = vld [vmem:[#allocation9 + $0x18] sm:$0xff]   ;;  %v799_v53 = vrot.slane %v778_v8, %v360_v47 }
 0x19d   : > { %v694_v38 = vpop.f32.mrb[6].mxu0 }
 0x19e   : > { %v1544_v40 = vpop.f32.mrb[7].mxu0 }
 0x19f   : > { %v1789_v40 = vld [vmem:[#allocation9 + $0x30] sm:$0xff]  }
 0x20b   : > { %v698_v55 = vpop.xlane.xlu0 %697 }
 0x20c   : > { %vm699_vm2 = vcmp.eq.f32.partialorder %v2243_v25, %v698_v55 }
 0x20d   : > { %v700_v56 = vsel %vm699_vm2, %v2263_v54, 128 }
 0x20e   : > { %v702_v57 = vshra.s32 %v700_v56, 16  ;;  %v701_v23 = vand.u32 65535, %v700_v56 }
 0x210   : > { %v704_v58 = vcvt.s32.f32 %v702_v57  ;;  %v703_v25 = vcvt.s32.f32 %v701_v23  ;;  %v651_v57 = vadd.f32 %v650_v19, %v353_v49 }
 0x212   : > { %705 = vmin.xlane.f32.xlu0 %v704_v58 }
 0x29f   : > { %v706_v24 = vpop.xlane.xlu0 %705 }
 0x2a0   : > { %vm707_vm3 = vcmp.eq.f32.partialorder %v704_v58, %v706_v24  ;;  %v712_v48 = vcvt.f32.s32 %v706_v24 }
 0x2a1   : > { %v708_v27 = vsel %vm707_vm3, %v703_v25, inf }
 0x2a2   : > { %709 = vmin.xlane.f32.xlu1 %v708_v27  ;;  %v713_v55 = vshll.u32 %v712_v48, 16  ;;  %v787_v48 = vrot.slane %v778_v8, %v348_v46 }
 0x32f   : > { %v710_v52 = vpop.xlane.xlu1 %709 }
 0x330   : > { %v711_v56 = vcvt.f32.s32 %v710_v52 }
 0x332   : > { %v714_v58 = vadd.s32 %v713_v55, %v711_v56 }
 0x334   : > { %vm715_vm4 = vcmp.eq.s32.totalorder %v714_v58, 1  ;;  %vm719_vm5 = vcmp.eq.s32.totalorder %v714_v58, 2  ;;  %vm723_vm6 = vcmp.eq.s32.totalorder %v714_v58, 3 }
 0x335   : > { %v718_v62 = vsel %vm715_vm4, %v651_v57, %v612_v60 }
 0x336   : > { %v722_v63 = vsel %vm719_vm5, %v653_v59, %v718_v62 }
 0x337   : > { %v726_v1 = vsel %vm723_vm6, %v692_v61, %v722_v63 }
 0x338   : > { %v727_v2 = vpack.c.bf16 %v726_v1, %v726_v1 }
 0x33a   : > { %1046 = vmatmul.mubr.bf16.vlgmr.msra.gmra.mrb[4].mxu1 %v727_v2  ;;  %1087 = vmatmul.mubr.bf16.vlgmr.msra.gmra.mrb[8].mxu0 %v727_v2 }
 0x33b   : > { %1546 = vmatpush3.bf16.msra.mxu1 %v1775_v0  ;;  %1561 = vmatprep.mubr.msk.bf16.mxu1 %vm1993_vm1, %v1992_v31 }
 0x33c   : > { %1547 = vmatprep.subr.bf16.mxu1 %v1992_v31  ;;  %1581 = vmatprep.mubr.msk.bf16.mxu0 %vm1993_vm1, %v1992_v31 }
 0x33d   : > { %1566 = vmatpush3.bf16.msra.mxu0 %v1783_v30 }
 0x33e   : > { %1567 = vmatprep.subr.bf16.mxu0 %v1992_v31 }
 0x33f   : > { %1548 = vmatpush3.bf16.msra.mxu1 %v1776_v22 }
 0x340   : > { %1549 = vmatprep.subr.bf16.mxu1 %v1992_v31 }
 0x341   : > { %1568 = vmatpush3.bf16.msra.mxu0 %v1784_v32 }
 0x342   : > { %1569 = vmatprep.subr.bf16.mxu0 %v1992_v31 }
 0x343   : > { %1550 = vmatpush3.bf16.msra.mxu1 %v1777_v26 }
 0x344   : > { %1551 = vmatprep.subr.bf16.mxu1 %v1992_v31 }
 0x345   : > { %1570 = vmatpush3.bf16.msra.mxu0 %v1785_v33 }
 0x346   : > { %1571 = vmatprep.subr.bf16.mxu0 %v1992_v31 }
 0x347   : > { %1552 = vmatpush3.bf16.msra.mxu1 %v1778_v3 }
 0x348   : > { %1553 = vmatprep.subr.bf16.mxu1 %v1992_v31 }
 0x349   : > { %1572 = vmatpush3.bf16.msra.mxu0 %v1786_v34 }
 0x34a   : > { %1573 = vmatprep.subr.bf16.mxu0 %v1992_v31 }
 0x34b   : > { %1554 = vmatpush3.bf16.msra.mxu1 %v1779_v4 }
 0x34c   : > { %1555 = vmatprep.subr.bf16.mxu1 %v1992_v31 }
 0x34d   : > { %1574 = vmatpush3.bf16.msra.mxu0 %v1787_v35 }
 0x34e   : > { %1575 = vmatprep.subr.bf16.mxu0 %v1992_v31 }
 0x34f   : > { %1556 = vmatpush3.bf16.msra.mxu1 %v1780_v5 }
 0x350   : > { %1557 = vmatprep.subr.bf16.mxu1 %v1992_v31 }
 0x353   : > { %1558 = vmatpush3.bf16.msra.mxu1 %v1781_v6 }
 0x354   : > { %1559 = vmatprep.subr.bf16.mxu1 %v1992_v31 }
 0x357   : > { %1560 = vmatpush3.bf16.msra.mxu1 %v1782_v7 }
 0x35a   : > { %1562 = vmatmul.mubr.bf16.vlgmr.msra.gmra.mrb[8].mxu1 %v727_v2 }
 0x40d   : > { %v1047_v10 = vpop.f32.mrb[4].mxu1  ;;  %v1088_v11 = vpop.f32.mrb[8].mxu0 }
 0x40e   : > { %v1048_v12 = vadd.f32 %v1047_v10, %v783_v9  ;;  %v1049_v13 = vpop.f32.mrb[5].mxu1  ;;  %v1090_v14 = vpop.f32.mrb[9].mxu0  ;;  %v1089_v55 = vadd.f32 %v1088_v11, %v791_v43 }
 0x40f   : > { %v1051_v15 = vpop.f32.mrb[6].mxu1  ;;  %v1092_v16 = vpop.f32.mrb[10].mxu0  ;;  %v1050_v56 = vadd.f32 %v1049_v13, %v787_v48  ;;  %v1091_v57 = vadd.f32 %v1090_v14, %v795_v50 }
 0x410   : > { %v1052_v17 = vpop.f32.mrb[7].mxu1  ;;  %v1093_v18 = vpop.f32.mrb[11].mxu0  ;;  %1135 = vmax.xlane.f32.xlu1 %v1048_v12 }
 0x42d   : > { %v1129_v19 = vpop.f32.mrb[8].mxu1 }
 0x42e   : > { %v1563_v23 = vpop.f32.mrb[9].mxu1  ;;  %v1130_v44 = vadd.f32 %v1129_v19, %v799_v53 }
 0x42f   : > { %v1132_v24 = vpop.f32.mrb[10].mxu1 }
 0x430   : > { %v1564_v25 = vpop.f32.mrb[11].mxu1 }
 0x49d   : > { %v1136_v27 = vpop.xlane.xlu1 %1135 }
 0x49e   : > { %vm1137_vm7 = vcmp.eq.f32.partialorder %v1048_v12, %v1136_v27 }
 0x49f   : > { %v1138_v28 = vsel %vm1137_vm7, %v2263_v54, 128  ;;  %v1788_v54 = vld [vmem:[#allocation9 + $0x28] sm:$0xff]  }
 0x4a0   : > { %v1140_v29 = vshra.s32 %v1138_v28, 16  ;;  %1576 = vmatpush3.bf16.msra.mxu0 %v1788_v54  ;;  %v1139_v36 = vand.u32 65535, %v1138_v28 }
 0x4a1   : > { %1577 = vmatprep.subr.bf16.mxu0 %v1992_v31 }
 0x4a2   : > { %v1142_v21 = vcvt.s32.f32 %v1140_v29  ;;  %v1141_v38 = vcvt.s32.f32 %v1139_v36 }
 0x4a4   : > { %1143 = vmin.xlane.f32.xlu0 %v1142_v21  ;;  %1578 = vmatpush3.bf16.msra.mxu0 %v1789_v40 }
 0x4a5   : > { %1579 = vmatprep.subr.bf16.mxu0 %v1992_v31 }
 0x4a8   : > { %1580 = vmatpush3.bf16.msra.mxu0 %v1790_v41 }
 0x531   : > { %v1144_v37 = vpop.xlane.xlu0 %1143 }
 0x532   : > { %vm1145_vm8 = vcmp.eq.f32.partialorder %v1142_v21, %v1144_v37  ;;  %v1150_v42 = vcvt.f32.s32 %v1144_v37 }
 0x533   : > { %v1146_v39 = vsel %vm1145_vm8, %v1141_v38, inf }
 0x534   : > { %1147 = vmin.xlane.f32.xlu1 %v1146_v39  ;;  %v1151_v51 = vshll.u32 %v1150_v42, 16 }
 0x5c1   : > { %v1148_v49 = vpop.xlane.xlu1 %1147 }
 0x5c2   : > { %v1149_v52 = vcvt.f32.s32 %v1148_v49 }
 0x5c4   : > { %v1152_v31 = vadd.s32 %v1151_v51, %v1149_v52 }
 0x5c6   : > { %vm1153_vm9 = vcmp.eq.s32.totalorder %v1152_v31, 1  ;;  %vm1157_vm10 = vcmp.eq.s32.totalorder %v1152_v31, 2  ;;  %vm1161_vm11 = vcmp.eq.s32.totalorder %v1152_v31, 3 }
 0x5c7   : > { %v1156_v58 = vsel %vm1153_vm9, %v1089_v55, %v1050_v56 }
 0x5c8   : > { %v1160_v46 = vsel %vm1157_vm10, %v1091_v57, %v1156_v58 }
 0x5c9   : > { %v1164_v59 = vsel %vm1161_vm11, %v1130_v44, %v1160_v46 }
 0x5ca   : > { %v1165_v45 = vpack.c.bf16 %v1164_v59, %v1164_v59 }
 0x5cc   : > { %1582 = vmatmul.mubr.bf16.vlgmr.msra.gmra.mrb[12].mxu0 %v1165_v45 }
 0x69f   : > { %v1271_v47 = vpop.f32.mrb[12].mxu0 }
 0x6a0   : > { %v1272_v60 = vadd.f32 %v1485_v20, %v1271_v47  ;;  %v1583_v61 = vpop.f32.mrb[13].mxu0 }
 0x6a1   : > { %v1274_v62 = vpop.f32.mrb[14].mxu0 }
 0x6a2   : > { %1277 = vst [vmem:[%s283_s28] sm:$0xff] %v1272_v60  ;;  %v1584_v63 = vpop.f32.mrb[15].mxu0 }
 0x6a3   : > { %1918 = shalt.err (!%p1915_p4)
}
 0x6a4   : > { %s1919_s14 = scalar_lea.hbm %s2323_s29, 128  ;;  %s1923_s24 = scalar_lea.hbm %s2372_s5, 256 }
 0x6a5   : > { %p1920_p0 = scmp.ne.s32.totalorder %s2323_s29, %s1919_s14  ;;  %p1924_p11 = scmp.lt.u32.totalorder %s2323_s29, %s2372_s5 }
 0x6a6   : > { %p1925_p13 = scmp.lt.u32.totalorder %s1923_s24, %s1919_s14  ;;  %p1927_p10 = scmp.lt.u32.totalorder %s1919_s14, %s2323_s29 }
 0x6a7   : > { %p1921_p9 = pnand %p1920_p0, %p2167_p5 }
 0x6a8   : > { %p1926_p6 = por %p1925_p13, %p1924_p11 }
 0x6a9   : > { %p1922_p8 = pneg %p1921_p9 }
 0x6aa   : > { %p1928_p3 = por %p1927_p10, %p1926_p6 }
 0x6ac   : > { %p1929_p7 = pnand %p1928_p3, %p1922_p8 }
 0x6ae   : > { %1932 = shalt.err (!%p1929_p7)
}
 0x6af   : > { %1599 = dma.vmem_to_hbm [thread:$0]  (%p2167_p5), %s2325_s12, 128, %s2323_s29, %s1279_s9  }
 0x6b0 PF: > { %s1304_s6 = sand.u32 1, %s1967_s18   ;;  %p2390_p12 = scmp.ne.s32.totalorder %s2377_s25, 0 }
 0x6b1   : > { %p2391_p2 = scmp.ge.s32.totalorder %s1979_s21, 2  ;;  %s1305_s28 = scalar_lea.sflag [#allocation5], %s1304_s6 }
 0x6b3   : > { %p1616_p1 = pnand %p2391_p2, %p2390_p12 }
 0x6b5   : > { %1962 = dma.done.wait (!%p1616_p1), %s1305_s28, 128  }
 0x6b6   : > { %1964 = vsyncadd (!%p1616_p1), %s1305_s28, 4294967168  ;;  %p20_p4 = scmp.ge.s32.totalorder %s2153_s16, 4   ;;  %s2392_s18 = smov %s1971_s19 }
 0x6b7   : > { %s2393_s19 = smov %s1975_s20  ;;  %s2394_s20 = smov %s2163_s30 }
 0x6b8   : > { %s2395_s21 = smov %s2153_s16  ;;  %22 = sbr.rel (!%p20_p4) target bundleno = 7 (0x7), region = 99 }
 0x6bf   :  { %1310 = vsyncpa [#allocation4], 1 }
 0x6c0   :  { %1312 = vsyncpa [#allocation4 + $0x1], 1 }
 0x6c1   :  { %1313 = vsyncpa [#allocation7], 1 }
 0x6c2   :  { %1314 = vsyncpa [#allocation10], 1 }
 0x6c3   :  { %1315 = vsyncpa [#allocation5], 1 }
 0x6c4   :  { %1317 = vsyncpa [#allocation5 + $0x1], 1 }

// kernel: tpu_custom_call.1
= control target key start
LH: loop header
LB: loop body
LE: loop exit
PB: predicated region body
PF: predicated region fallthrough
CT: control target
= control target key end

     0   :  { %10 = vsyncpa [#allocation4], 0  ;;  %s2367_s0 = inlined_call_operand.hbm [shape: bf16[16,32], index: 0, kind: input, shape index: {}]   ;;  %s2368_s1 = inlined_call_operand.hbm [shape: bf16[2,128,640], index: 1, kind: input, shape index: {}]   ;;  %s2369_s2 = inlined_call_operand.hbm [shape: f32[2,1,640], index: 2, kind: input, shape index: {}]   ;;  %s2370_s3 = inlined_call_operand.hbm [shape: bf16[128,128], index: 3, kind: input, shape index: {}]   ;;  %s2371_s4 = inlined_call_operand.vmem [shape: f32[1,128], index: 4, kind: input, shape index: {}]   ;;  %s2372_s5 = inlined_call_operand.hbm [shape: f32[16,128], index: 5, kind: output, shape index: {}]  }
   0x1   :  { %12 = vsyncpa [#allocation4 + $0x1], 0 }
   0x2   :  { %13 = vsyncpa [#allocation7], 0 }
   0x3   :  { %14 = vsyncpa [#allocation10], 0 }
   0x4   :  { %15 = vsyncpa [#allocation5], 0 }
   0x5   :  { %17 = vsyncpa [#allocation5 + $0x1], 0  ;;  %s2025_s18 = smov 0   ;;  %s2027_s19 = smov 0  }
   0x6   :  { %s2029_s20 = smov 0   ;;  %s2031_s21 = smov 0  }
   0x7 LB: > { %s2046_s22 = sadd.s32 4294967295, %s1979_s21   ;;  %s1391_s23 = sadd.s32 4294967294, %s1979_s21   ;;  %s1979_s21 = sphi %s2031_s21, %s2395_s21   ;;  %s1975_s20 = sphi %s2029_s20, %s2394_s20   ;;  %s1971_s19 = sphi %s2027_s19, %s2393_s19   ;;  %s1967_s18 = sphi %s2025_s18, %s2392_s18  }
   0x8   : > { %p43_p0 = scmp.ne.s32.totalorder %s1971_s19, %s1967_s18  ;;  %p2373_p1 = scmp.eq.s32.totalorder %s2046_s22, 0 }
   0x9   : > { %p157_p3 = scmp.eq.s32.totalorder %s1391_s23, 1  ;;  %p1392_p5 = scmp.ge.s32.totalorder %s1979_s21, 1 }
   0xa   : > { %p2055_p4 = por %p2373_p1, %p43_p0  ;;  %p164_p7 = scmp.lt.s32.totalorder %s1979_s21, 3 }
   0xb   : > { %p2060_p6 = por %p157_p3, %p43_p0  ;;  %s1981_s27 = smov [#allocation6]  }
   0xc   : > { %s2376_s24 = scalar_select %p2055_p4, 1, 0 }
   0xd   : > { %s2377_s25 = scalar_select %p2060_p6, 1, 0 }
   0xe   : > { %p2065_p8 = pnand %p1392_p5, %p164_p7  ;;  %s176_s28 = sshll.u32 %s1981_s27, 4  ;;  %s2069_s28 = int_to_ptr.vmem [resolvable:$true] %s176_s28 }
   0xf   : > { %s1982_s30 = smov [#allocation8]   ;;  %s1791_s9 = scalar_lea.hbm %s2368_s1, 10240 }
  0x10   : > { %s2378_s26 = scalar_select %p2065_p8, 1, 0 }
  0x11   : > { %p1601_p9 = pneg %p2065_p8  ;;  %s189_s6 = sshll.u32 %s1982_s30, 4  ;;  %s2080_s6 = int_to_ptr.vmem [resolvable:$true] %s189_s6 }
  0x12   : > { %p1792_p12 = scmp.ne.s32.totalorder %s2368_s1, %s1791_s9  ;;  %p1798_p5 = scmp.lt.u32.totalorder %s1791_s9, %s2368_s1 }
  0x13   : > { %p2076_p11 = pnand %p1601_p9, %p2373_p1 }
  0x15   : > { %p2090_p13 = pneg %p2076_p11 }
  0x17   : > { %p1794_p0 = pnand %p2090_p13, %p1792_p12 }
  0x19   : > { %p1795_p3 = pneg %p1794_p0 }
  0x1b   : > { %p1800_p7 = pnand %p1798_p5, %p1795_p3 }
  0x1d   : > { %1803 = shalt.err (!%p1800_p7)
}
  0x1e   : > { %s1804_s15 = scalar_lea.vmem %s2069_s28, 10240  ;;  %p1812_p2 = scmp.lt.s32.totalorder %s2069_s28, %s2069_s28 }
  0x1f   : > { %p1805_p9 = scmp.ne.s32.totalorder %s2069_s28, %s1804_s15  ;;  %p1813_p6 = scmp.lt.s32.totalorder %s1804_s15, %s1804_s15 }
  0x21   : > { %p1807_p10 = pnand %p1805_p9, %p2090_p13  ;;  %p1814_p12 = por %p1813_p6, %p1812_p2 }
  0x23   : > { %p1808_p1 = pneg %p1807_p10 }
  0x25   : > { %p1815_p0 = pnand %p1814_p12, %p1808_p1 }
  0x27   : > { %1818 = shalt.err (!%p1815_p0)
}
  0x28   : > { %s1983_s16 = smov 320   ;;  %s1984_s17 = smov 20  }
  0x29   : > { %1604 = dma.hbm_to_vmem [thread:$0]  (!%p2076_p11), %s2368_s1, 10240, %s2069_s28, [#allocation7], %s1983_s16, %s1983_s16, %s1984_s17  }
  0x2a   : > { %s1819_s8 = scalar_lea.hbm %s2369_s2, 160 }
  0x2b   : > { %p1820_p2 = scmp.ne.s32.totalorder %s2369_s2, %s1819_s8  ;;  %p1826_p10 = scmp.lt.u32.totalorder %s1819_s8, %s2369_s2 }
  0x2d   : > { %p1822_p1 = pnand %p1820_p2, %p2090_p13 }
  0x2f   : > { %p1823_p6 = pneg %p1822_p1 }
  0x31   : > { %p1828_p3 = pnand %p1826_p10, %p1823_p6 }
  0x33   : > { %1831 = shalt.err (!%p1828_p3)
}
  0x34   : > { %s1832_s28 = scalar_lea.vmem %s2080_s6, 160  ;;  %p1840_p12 = scmp.lt.s32.totalorder %s2080_s6, %s2080_s6 }
  0x35   : > { %p1833_p5 = scmp.ne.s32.totalorder %s2080_s6, %s1832_s28  ;;  %p1841_p0 = scmp.lt.s32.totalorder %s1832_s28, %s1832_s28 }
  0x37   : > { %p1835_p7 = pnand %p1833_p5, %p2090_p13  ;;  %p1842_p2 = por %p1841_p0, %p1840_p12 }
  0x39   : > { %p1836_p9 = pneg %p1835_p7 }
  0x3b   : > { %p1843_p1 = pnand %p1842_p2, %p1836_p9 }
  0x3d   : > { %1846 = shalt.err (!%p1843_p1)
}
  0x3e   : > { %s1985_s14 = smov 80   ;;  %s1986_s15 = smov 5  }
  0x3f   : > { %1607 = dma.hbm_to_vmem [thread:$0]  (!%p2076_p11), %s2369_s2, 160, %s2080_s6, [#allocation7], %s1985_s14, %s1985_s14, %s1986_s15  }
  0x40   : > { %s1987_s23 = smov [#allocation9]   ;;  %s1847_s8 = scalar_lea.hbm %s2370_s3, 1024 }
  0x41   : > { %s202_s27 = sshll.u32 %s1987_s23, 4  ;;  %p1848_p6 = scmp.ne.s32.totalorder %s2370_s3, %s1847_s8  ;;  %s203_s27 = int_to_ptr.vmem [resolvable:$true] %s202_s27 }
  0x42   : > { %p1854_p5 = scmp.lt.u32.totalorder %s1847_s8, %s2370_s3 }
  0x43   : > { %p1850_p10 = pnand %p1848_p6, %p2090_p13 }
  0x45   : > { %p1851_p3 = pneg %p1850_p10 }
  0x47   : > { %p1856_p7 = pnand %p1854_p5, %p1851_p3 }
  0x49   : > { %1859 = shalt.err (!%p1856_p7)
}
  0x4a   : > { %s1860_s6 = scalar_lea.vmem %s203_s27, 1024  ;;  %p1868_p2 = scmp.lt.s32.totalorder %s203_s27, %s203_s27 }
  0x4b   : > { %p1861_p9 = scmp.ne.s32.totalorder %s203_s27, %s1860_s6  ;;  %p1869_p1 = scmp.lt.s32.totalorder %s1860_s6, %s1860_s6 }
  0x4d   : > { %p1863_p12 = pnand %p1861_p9, %p2090_p13  ;;  %p1870_p4 = por %p1869_p1, %p1868_p2 }
  0x4f   : > { %p1864_p0 = pneg %p1863_p12 }
  0x51   : > { %p1871_p8 = pnand %p1870_p4, %p1864_p0 }
  0x53   : > { %1874 = shalt.err (!%p1871_p8)
}
  0x54   : > { %s1988_s28 = smov 64   ;;  %s1989_s12 = smov 4  }
  0x55   : > { %1610 = dma.hbm_to_vmem [thread:$0]  (!%p2076_p11), %s2370_s3, 1024, %s203_s27, [#allocation10], %s1988_s28, %s1988_s28, %s1989_s12  }
  0x56   : > { %s2153_s16 = sadd.s32 1, %s1979_s21   ;;  %s30_s23 = sadd.s32 1, %s1975_s20 }
  0x57   : > { %s27_s17 = ssub.s32 %s1979_s21, %s2153_s16  ;;  %p37_p8 = scmp.ne.s32.totalorder %s1975_s20, %s1971_s19 }
  0x58   : > { %p28_p4 = scmp.eq.s32.totalorder %s27_s17, 0  ;;  %p38_p13 = scmp.eq.s32.totalorder %s1979_s21, 0 }
  0x59   : > { %p1622_p6 = scmp.lt.s32.totalorder %s1979_s21, 2  ;;  %p2381_p3 = scmp.eq.s32.totalorder %s2046_s22, 1 }
  0x5a   : > { %s2163_s30 = scalar_select %p28_p4, %s1975_s20, %s30_s23  }
  0x5b   : > { %p39_p10 = por %p38_p13, %p37_p8  ;;  %p2167_p5 = por %p2381_p3, %p37_p8 }
  0x5c   : > { %s219_s29 = sand.u32 1, %s1975_s20   ;;  %s1398_s8 = sshll.u32 %s1979_s21, 6 }
  0x5d   : > { %s1397_s27 = sshll.u32 %s219_s29, 2  ;;  %s2176_s11 = scalar_lea.hbm %s2367_s0, %s1398_s8 }
  0x5e   : > { %s223_s13 = scalar_lea.vmem [#allocation3], %s1397_s27  ;;  %p2178_p11 = pnand %p1622_p6, %p39_p10 }
  0x5f   : > { %s230_s6 = sshll.u32 %s223_s13, 4  ;;  %s220_s12 = scalar_lea.sflag [#allocation4], %s219_s29  ;;  %s2182_s6 = int_to_ptr.vmem [resolvable:$true] %s230_s6 }
  0x60   : > { %s1875_s14 = scalar_lea.hbm %s2176_s11, 64  ;;  %p1877_p9 = pneg %p2178_p11 }
  0x61   : > { %p1876_p7 = scmp.ne.s32.totalorder %s2176_s11, %s1875_s14  ;;  %s1880_s23 = scalar_lea.hbm %s2367_s0, 128 }
  0x62   : > { %p1881_p2 = scmp.lt.u32.totalorder %s2176_s11, %s2367_s0  ;;  %p1882_p1 = scmp.lt.u32.totalorder %s1880_s23, %s1875_s14 }
  0x63   : > { %p1878_p12 = pnand %p1877_p9, %p1876_p7  ;;  %p1884_p8 = scmp.lt.u32.totalorder %s1875_s14, %s2176_s11 }
  0x64   : > { %p1883_p4 = por %p1882_p1, %p1881_p2 }
  0x65   : > { %p1879_p0 = pneg %p1878_p12 }
  0x66   : > { %p1885_p13 = por %p1884_p8, %p1883_p4 }
  0x68   : > { %p1886_p6 = pnand %p1885_p13, %p1879_p0 }
  0x6a   : > { %1889 = shalt.err (!%p1886_p6)
}
  0x6b   : > { %s1890_s29 = scalar_lea.vmem %s2182_s6, 64  ;;  %s1990_s9 = smov [#allocation3]  }
  0x6c   : > { %p1891_p10 = scmp.ne.s32.totalorder %s2182_s6, %s1890_s29  ;;  %s1895_s10 = sshll.u32 %s1990_s9, 4  ;;  %s1896_s10 = int_to_ptr.vmem [resolvable:$false] %s1895_s10 }
  0x6d   : > { %s1897_s13 = scalar_lea.vmem %s1896_s10, 128  ;;  %p1898_p12 = scmp.lt.s32.totalorder %s2182_s6, %s1896_s10 }
  0x6e   : > { %p1893_p3 = pnand %p1891_p10, %p1877_p9  ;;  %p1899_p2 = scmp.lt.s32.totalorder %s1897_s13, %s1890_s29 }
  0x70   : > { %p1894_p7 = pneg %p1893_p3  ;;  %p1900_p1 = por %p1899_p2, %p1898_p12 }
  0x72   : > { %p1901_p4 = pnand %p1900_p1, %p1894_p7 }
  0x74   : > { %1904 = shalt.err (!%p1901_p4)
}
  0x75   : > { %1614 = dma.hbm_to_vmem [thread:$0]  (!%p2178_p11), %s2176_s11, 64, %s2182_s6, %s220_s12  }
  0x76   : > { %p2384_p0 = scmp.ne.s32.totalorder %s2378_s26, 0 }
  0x77   : > { %s2212_s14 = sand.u32 (!%p2384_p0), 1, %s1971_s19   ;;  %p2385_p9 = scmp.ne.s32.totalorder (!%p2384_p0), %s2376_s24, 0 }
  0x78   : > { %239 = sbr.rel (%p2384_p0) target bundleno = 1712 (0x6b0), region = 40  ;;  %s1400_s15 = sshll.u32 (!%p2384_p0), %s2212_s14, 2 }
  0x79   : > { %s242_s17 = scalar_lea.sflag (!%p2384_p0), [#allocation4], %s2212_s14  ;;  %s245_s23 = scalar_lea.vmem (!%p2384_p0), [#allocation3], %s1400_s15 }
  0x7f   : > { %1950 = dma.done.wait (%p2385_p9), %s242_s17, 64  }
  0x80   : > { %1952 = vsyncadd (%p2385_p9), %s242_s17, 4294967232  ;;  %p2386_p8 = scmp.eq.s32.totalorder %s2046_s22, 0 }
  0x82   : > { %1954 = dma.done.wait (%p2386_p8), [#allocation7], 10400   ;;  %p2387_p11 = pmov %p2386_p8 }
  0x83   : > { %p2388_p13 = pmov %p2386_p8 }
  0x84   : > { %1956 = vsyncadd (%p2387_p11), [#allocation7], 4294956896 }
  0x85   : > { %1958 = dma.done.wait (%p2388_p13), [#allocation10], 1024   ;;  %p2389_p6 = pmov %p2386_p8 }
  0x86   : > { %v1991_v0 = vmov 0   ;;  %v1671_v1 = vld [vmem:[#allocation6 + $0x4] ss:$20 sps:$4 sm:$0xff]   ;;  %v1673_v2 = vld [vmem:[#allocation6] ss:$20 sps:$4 sm:$0xff]   ;;  %vm287_vm0 = vcmask 257024   ;;  %v290_v19 = vlaneseq }
  0x87   : > { %1960 = vsyncadd (%p2389_p6), [#allocation10], 4294966272  ;;  %285 = vst [vmem:[#allocation2] sm:$0xf] %v1991_v0  ;;  %607 = vmatprep.mubr.bf16.mxu0 %v1991_v0  ;;  %648 = vmatprep.mubr.bf16.mxu1 %v1991_v0  ;;  %v1674_v3 = vld [vmem:[#allocation6 + $0x2c] ss:$20 sps:$4 sm:$0xff]  }
  0x88   : > { %575 = vmatprep.subr.bf16.mxu0 %v1671_v1  ;;  %v1676_v4 = vld [vmem:[#allocation6 + $0x28] ss:$20 sps:$4 sm:$0xff]   ;;  %v1679_v6 = vld [vmem:[#allocation6 + $0x50] ss:$20 sps:$4 sm:$0xff]   ;;  %v1682_v8 = vld [vmem:[#allocation6 + $0x78] ss:$20 sps:$4 sm:$0xff]  }
  0x89   : > { %576 = vmatpush1.bf16.msra.mxu0 %v1673_v2  ;;  %v1677_v5 = vld [vmem:[#allocation6 + $0x54] ss:$20 sps:$4 sm:$0xff]   ;;  %v1680_v7 = vld [vmem:[#allocation6 + $0x7c] ss:$20 sps:$4 sm:$0xff]   ;;  %v1683_v10 = vld [vmem:[#allocation6 + $0xa4] ss:$20 sps:$4 sm:$0xff]  }
  0x8a   : > { %577 = vmatprep.subr.bf16.mxu0 %v1674_v3  ;;  %v286_v9 = vld [vmem:[%s245_s23] sm:$0xf]  ;;  %v1685_v11 = vld [vmem:[#allocation6 + $0xa0] ss:$20 sps:$4 sm:$0xff]   ;;  %v1691_v15 = vld [vmem:[#allocation6 + $0xf0] ss:$20 sps:$4 sm:$0xff]  }
  0x8b   : > { %288 = vst.msk [vmem:[#allocation2] sm:$0xf] %vm287_vm0, %v286_v9  ;;  %v1686_v12 = vld [vmem:[#allocation6 + $0xcc] ss:$20 sps:$4 sm:$0xff]   ;;  %v1688_v13 = vld [vmem:[#allocation6 + $0xc8] ss:$20 sps:$4 sm:$0xff]  }
  0x8c   : > { %v1689_v14 = vld [vmem:[#allocation6 + $0xf4] ss:$20 sps:$4 sm:$0xff]   ;;  %v1692_v16 = vld [vmem:[#allocation6 + $0x11c] ss:$20 sps:$4 sm:$0xff]   ;;  %v1694_v17 = vld [vmem:[#allocation6 + $0x118] ss:$20 sps:$4 sm:$0xff]  }
  0x8d   : > { %578 = vmatpush1.bf16.msra.mxu0 %v1676_v4  ;;  %v2235_v20 = vshrl.u32 %v290_v19, 7  ;;  %v2238_v22 = vld [vmem:[#allocation8] sm:$0x1f]  ;;  %v1697_v30 = vld [vmem:[#allocation6 + $0x8] ss:$20 sps:$4 sm:$0xff]   ;;  %v1992_v31 = vmov 0.0  }
  0x8e   : > { %579 = vmatprep.subr.bf16.mxu0 %v1677_v5  ;;  %v1695_v29 = vld [vmem:[#allocation6 + $0xc] ss:$20 sps:$4 sm:$0xff]   ;;  %v1698_v32 = vld [vmem:[#allocation6 + $0x10] ss:$20 sps:$4 sm:$0xff]   ;;  %v1699_v33 = vld [vmem:[#allocation6 + $0x34] ss:$20 sps:$4 sm:$0xff]  }
  0x8f   : > { %v344_v21 = vsub.s32 0, %v2235_v20  ;;  %vm1993_vm1 = vmmov 0   ;;  %616 = vmatprep.subr.bf16.mxu1 %v1695_v29  ;;  %v1701_v34 = vld [vmem:[#allocation6 + $0x30] ss:$20 sps:$4 sm:$0xff]   ;;  %v1702_v35 = vld [vmem:[#allocation6 + $0x38] ss:$20 sps:$4 sm:$0xff]  }
  0x90   : > { %617 = vmatpush1.bf16.msra.mxu1 %v1697_v30  ;;  %v1703_v36 = vld [vmem:[#allocation6 + $0x5c] ss:$20 sps:$4 sm:$0xff]   ;;  %v1705_v37 = vld [vmem:[#allocation6 + $0x58] ss:$20 sps:$4 sm:$0xff]   ;;  %v1706_v38 = vld [vmem:[#allocation6 + $0x60] ss:$20 sps:$4 sm:$0xff]  }
  0x91   : > { %580 = vmatpush1.bf16.msra.mxu0 %v1679_v6  ;;  %v345_v23 = vrot.slane %v2238_v22, %v344_v21  ;;  %618 = vmatprep.subr.bf16.mxu1 %v1699_v33  ;;  %v1707_v39 = vld [vmem:[#allocation6 + $0x84] ss:$20 sps:$4 sm:$0xff]   ;;  %v1709_v40 = vld [vmem:[#allocation6 + $0x80] ss:$20 sps:$4 sm:$0xff]   ;;  %v1710_v41 = vld [vmem:[#allocation6 + $0x88] ss:$20 sps:$4 sm:$0xff]  }
  0x92   : > { %581 = vmatprep.subr.bf16.mxu0 %v1680_v7  ;;  %v2231_v18 = vld [vmem:[#allocation2] sm:$0xf]  ;;  %v1711_v42 = vld [vmem:[#allocation6 + $0xac] ss:$20 sps:$4 sm:$0xff]   ;;  %v1713_v43 = vld [vmem:[#allocation6 + $0xa8] ss:$20 sps:$4 sm:$0xff]  }
  0x93   : > { %v1714_v44 = vld [vmem:[#allocation6 + $0xb0] ss:$20 sps:$4 sm:$0xff]   ;;  %v1715_v45 = vld [vmem:[#allocation6 + $0xd4] ss:$20 sps:$4 sm:$0xff]   ;;  %v1718_v47 = vld [vmem:[#allocation6 + $0xd8] ss:$20 sps:$4 sm:$0xff]  }
  0x94   : > { %619 = vmatpush1.bf16.msra.mxu1 %v1701_v34  ;;  %v1717_v46 = vld [vmem:[#allocation6 + $0xd0] ss:$20 sps:$4 sm:$0xff]   ;;  %v1721_v49 = vld [vmem:[#allocation6 + $0xf8] ss:$20 sps:$4 sm:$0xff]   ;;  %v1722_v50 = vld [vmem:[#allocation6 + $0x100] ss:$20 sps:$4 sm:$0xff]  }
  0x95   : > { %582 = vmatpush1.bf16.msra.mxu0 %v1682_v8  ;;  %620 = vmatprep.subr.bf16.mxu1 %v1703_v36  ;;  %v1719_v48 = vld [vmem:[#allocation6 + $0xfc] ss:$20 sps:$4 sm:$0xff]   ;;  %v1723_v51 = vld [vmem:[#allocation6 + $0x124] ss:$20 sps:$4 sm:$0xff]   ;;  %v1725_v52 = vld [vmem:[#allocation6 + $0x120] ss:$20 sps:$4 sm:$0xff]  }
  0x96   : > { %583 = vmatprep.subr.bf16.mxu0 %v1683_v10  ;;  %v1726_v53 = vld [vmem:[#allocation6 + $0x128] ss:$20 sps:$4 sm:$0xff]   ;;  %v2263_v54 = vand.u32 127, %v290_v19  ;;  %v1727_v59 = vld [vmem:[#allocation6 + $0x140] ss:$20 sps:$4 sm:$0xff]   ;;  %s1404_s24 = sshll.u32 %s2212_s14, 3 }
  0x97   : > { %v1729_v60 = vld [vmem:[#allocation6 + $0x144] ss:$20 sps:$4 sm:$0xff]   ;;  %v1730_v61 = vld [vmem:[#allocation6 + $0x148] ss:$20 sps:$4 sm:$0xff]   ;;  %v1732_v62 = vld [vmem:[#allocation6 + $0x14c] ss:$20 sps:$4 sm:$0xff]  }
  0x98   : > { %621 = vmatpush1.bf16.msra.mxu1 %v1705_v37  ;;  %v1735_v63 = vld [vmem:[#allocation6 + $0x16c] ss:$20 sps:$4 sm:$0xff]   ;;  %v1738_v1 = vld [vmem:[#allocation6 + $0x174] ss:$20 sps:$4 sm:$0xff]   ;;  %v1736_v2 = vld [vmem:[#allocation6 + $0x170] ss:$20 sps:$4 sm:$0xff]  }
  0x99   : > { %584 = vmatpush1.bf16.msra.mxu0 %v1685_v11  ;;  %622 = vmatprep.subr.bf16.mxu1 %v1707_v39  ;;  %v1741_v3 = vld [vmem:[#allocation6 + $0x194] ss:$20 sps:$4 sm:$0xff]   ;;  %v1744_v4 = vld [vmem:[#allocation6 + $0x19c] ss:$20 sps:$4 sm:$0xff]   ;;  %v1742_v6 = vld [vmem:[#allocation6 + $0x198] ss:$20 sps:$4 sm:$0xff]  }
  0x9a   : > { %585 = vmatprep.subr.bf16.mxu0 %v1686_v12  ;;  %v1739_v5 = vld [vmem:[#allocation6 + $0x190] ss:$20 sps:$4 sm:$0xff]   ;;  %v1745_v9 = vld [vmem:[#allocation6 + $0x1b8] ss:$20 sps:$4 sm:$0xff]   ;;  %v1748_v10 = vld [vmem:[#allocation6 + $0x1c0] ss:$20 sps:$4 sm:$0xff]  }
  0x9b   : > { %v1747_v7 = vld [vmem:[#allocation6 + $0x1bc] ss:$20 sps:$4 sm:$0xff]   ;;  %v1750_v8 = vld [vmem:[#allocation6 + $0x1c4] ss:$20 sps:$4 sm:$0xff]   ;;  %v1756_v12 = vld [vmem:[#allocation6 + $0x1ec] ss:$20 sps:$4 sm:$0xff]  }
  0x9c   : > { %623 = vmatpush1.bf16.msra.mxu1 %v1709_v40  ;;  %v1753_v11 = vld [vmem:[#allocation6 + $0x1e4] ss:$20 sps:$4 sm:$0xff]   ;;  %v1771_v39 = vld [vmem:[#allocation6 + $0x25c] ss:$20 sps:$4 sm:$0xff]   ;;  %s1495_s6 = sshll.u32 %s2046_s22, 7  ;;  %s283_s28 = scalar_lea.vmem [#allocation11], %s1404_s24 }
  0x9d   : > { %586 = vmatpush1.bf16.msra.mxu0 %v1688_v13  ;;  %624 = vmatprep.subr.bf16.mxu1 %v1711_v42  ;;  %v1751_v13 = vld [vmem:[#allocation6 + $0x1e0] ss:$20 sps:$4 sm:$0xff]   ;;  %v1763_v30 = vld [vmem:[#allocation6 + $0x230] ss:$20 sps:$4 sm:$0xff]   ;;  %s1292_s12 = sshll.u32 %s283_s28, 4  ;;  %s2323_s29 = scalar_lea.hbm %s2372_s5, %s1495_s6  ;;  %s2325_s12 = int_to_ptr.vmem [resolvable:$true] %s1292_s12 }
  0x9e   : > { %587 = vmatprep.subr.bf16.mxu0 %v1689_v14  ;;  %v1754_v14 = vld [vmem:[#allocation6 + $0x1e8] ss:$20 sps:$4 sm:$0xff]   ;;  %v1774_v42 = vld [vmem:[#allocation6 + $0x264] ss:$20 sps:$4 sm:$0xff]   ;;  %s1279_s9 = scalar_lea.sflag [#allocation5], %s2212_s14  ;;  %s1905_s22 = scalar_lea.vmem %s2325_s12, 128 }
  0x9f   : > { %p1906_p10 = scmp.ne.s32.totalorder %s2325_s12, %s1905_s22  ;;  %s1994_s10 = smov [#allocation11]  }
  0xa0   : > { %625 = vmatpush1.bf16.msra.mxu1 %v1713_v43  ;;  %v1772_v43 = vld [vmem:[#allocation6 + $0x260] ss:$20 sps:$4 sm:$0xff]   ;;  %s1909_s13 = sshll.u32 %s1994_s10, 4  ;;  %s1910_s13 = int_to_ptr.vmem [resolvable:$false] %s1909_s13 }
  0xa1   : > { %588 = vmatpush1.bf16.msra.mxu0 %v1691_v15  ;;  %626 = vmatprep.subr.bf16.mxu1 %v1715_v45  ;;  %v1759_v15 = vld [vmem:[#allocation6 + $0x20c] ss:$20 sps:$4 sm:$0xff]   ;;  %v356_v45 = vsub.s32 3, %v2235_v20  ;;  %p1907_p3 = pnand %p1906_p10, %p2167_p5  ;;  %s1911_s15 = scalar_lea.vmem %s1910_s13, 256 }
  0xa2   : > { %589 = vmatprep.subr.bf16.mxu0 %v1692_v16  ;;  %v1762_v16 = vld [vmem:[#allocation6 + $0x214] ss:$20 sps:$4 sm:$0xff]   ;;  %p1912_p12 = scmp.lt.s32.totalorder %s2325_s12, %s1910_s13  ;;  %p1913_p2 = scmp.lt.s32.totalorder %s1911_s15, %s1905_s22 }
  0xa3   : > { %p1908_p7 = pneg %p1907_p3 }
  0xa4   : > { %627 = vmatpush1.bf16.msra.mxu1 %v1717_v46  ;;  %v348_v46 = vsub.s32 1, %v2235_v20  ;;  %p1914_p1 = por %p1913_p2, %p1912_p12 }
  0xa5   : > { %590 = vmatpush1.bf16.msra.mxu0 %v1694_v17  ;;  %628 = vmatprep.subr.bf16.mxu1 %v1719_v48  ;;  %v1757_v17 = vld [vmem:[#allocation6 + $0x208] ss:$20 sps:$4 sm:$0xff]  }
  0xa6   : > { %1525 = vmatprep.subr.bf16.mxu0 %v1992_v31  ;;  %p1915_p4 = pnand %p1914_p1, %p1908_p7 }
  0xa8   : > { %608 = vmatmul.mubr.bf16.vlgmr.msra.gmra.mrb[0].mxu0 %v2231_v18  ;;  %629 = vmatpush1.bf16.msra.mxu1 %v1721_v49 }
  0xa9   : > { %1541 = vmatprep.mubr.msk.bf16.mxu0 %vm1993_vm1, %v1992_v31  ;;  %1526 = vmatpush3.bf16.msra.mxu0 %v1698_v32  ;;  %v1768_v32 = vld [vmem:[#allocation6 + $0x23c] ss:$20 sps:$4 sm:$0xff]  }
  0xaa   : > { %1527 = vmatprep.subr.bf16.mxu0 %v1992_v31  ;;  %630 = vmatprep.subr.bf16.mxu1 %v1723_v51  ;;  %v349_v51 = vrot.slane %v2238_v22, %v348_v46 }
  0xac   : > { %631 = vmatpush1.bf16.msra.mxu1 %v1725_v52 }
  0xad   : > { %1528 = vmatpush3.bf16.msra.mxu0 %v1702_v35  ;;  %1013 = vmatprep.subr.bf16.mxu1 %v1729_v60  ;;  %v1766_v35 = vld [vmem:[#allocation6 + $0x238] ss:$20 sps:$4 sm:$0xff]  }
  0xae   : > { %1529 = vmatprep.subr.bf16.mxu0 %v1992_v31 }
  0xaf   : > { %649 = vmatmul.mubr.bf16.vlgmr.msra.gmra.mrb[0].mxu1 %v2231_v18 }
  0xb0   : > { %1045 = vmatprep.mubr.bf16.mxu1 %v1991_v0  ;;  %1014 = vmatpush1.bf16.msra.mxu1 %v1727_v59 }
  0xb1   : > { %1530 = vmatpush3.bf16.msra.mxu0 %v1706_v38  ;;  %1015 = vmatprep.subr.bf16.mxu1 %v1735_v63 }
  0xb2   : > { %1531 = vmatprep.subr.bf16.mxu0 %v1992_v31 }
  0xb5   : > { %1532 = vmatpush3.bf16.msra.mxu0 %v1710_v41  ;;  %v1769_v41 = vld [vmem:[#allocation6 + $0x258] ss:$20 sps:$4 sm:$0xff]  }
  0xb6   : > { %1533 = vmatprep.subr.bf16.mxu0 %v1992_v31 }
  0xb9   : > { %1534 = vmatpush3.bf16.msra.mxu0 %v1714_v44  ;;  %v352_v44 = vsub.s32 2, %v2235_v20 }
  0xba   : > { %1535 = vmatprep.subr.bf16.mxu0 %v1992_v31 }
  0xbb   : > { %v353_v49 = vrot.slane %v2238_v22, %v352_v44 }
  0xbd   : > { %1536 = vmatpush3.bf16.msra.mxu0 %v1718_v47  ;;  %v360_v47 = vsub.s32 4, %v2235_v20  ;;  %v1485_v20 = vld [vmem:[%s2371_s4] ss:$0 sm:$0xff] }
  0xbe   : > { %1537 = vmatprep.subr.bf16.mxu0 %v1992_v31 }
  0xc1   : > { %1538 = vmatpush3.bf16.msra.mxu0 %v1722_v50  ;;  %v357_v50 = vrot.slane %v2238_v22, %v356_v45 }
  0xc2   : > { %1539 = vmatprep.subr.bf16.mxu0 %v1992_v31 }
  0xc5   : > { %1540 = vmatpush3.bf16.msra.mxu0 %v1726_v53  ;;  %v361_v53 = vrot.slane %v2238_v22, %v360_v47  ;;  %v1776_v22 = vld [vmem:[#allocation6 + $0x178] ss:$20 sps:$4 sm:$0xff]  }
  0xc6   : > { %1054 = vmatprep.subr.bf16.mxu0 %v1732_v62 }
  0xc8   : > { %1542 = vmatmul.mubr.bf16.vlgmr.msra.gmra.mrb[4].mxu0 %v2231_v18  ;;  %v1760_v18 = vld [vmem:[#allocation6 + $0x210] ss:$20 sps:$4 sm:$0xff]  }
  0xc9   : > { %1086 = vmatprep.mubr.bf16.mxu0 %v1991_v0  ;;  %v1733_v0 = vld [vmem:[#allocation6 + $0x168] ss:$20 sps:$4 sm:$0xff]   ;;  %1055 = vmatpush1.bf16.msra.mxu0 %v1730_v61 }
  0xca   : > { %1056 = vmatprep.subr.bf16.mxu0 %v1738_v1  ;;  %1016 = vmatpush1.bf16.msra.mxu1 %v1733_v0  ;;  %v1775_v0 = vld [vmem:[#allocation6 + $0x150] ss:$20 sps:$4 sm:$0xff]  }
  0xcb   : > { %1017 = vmatprep.subr.bf16.mxu1 %v1741_v3  ;;  %v1778_v3 = vld [vmem:[#allocation6 + $0x1c8] ss:$20 sps:$4 sm:$0xff]  }
  0xcd   : > { %1057 = vmatpush1.bf16.msra.mxu0 %v1736_v2 }
  0xce   : > { %1058 = vmatprep.subr.bf16.mxu0 %v1744_v4  ;;  %1018 = vmatpush1.bf16.msra.mxu1 %v1739_v5  ;;  %v1779_v4 = vld [vmem:[#allocation6 + $0x1f0] ss:$20 sps:$4 sm:$0xff]   ;;  %v1780_v5 = vld [vmem:[#allocation6 + $0x218] ss:$20 sps:$4 sm:$0xff]  }
  0xcf   : > { %1019 = vmatprep.subr.bf16.mxu1 %v1747_v7  ;;  %v1782_v7 = vld [vmem:[#allocation6 + $0x268] ss:$20 sps:$4 sm:$0xff]  }
  0xd1   : > { %1059 = vmatpush1.bf16.msra.mxu0 %v1742_v6  ;;  %v1781_v6 = vld [vmem:[#allocation6 + $0x240] ss:$20 sps:$4 sm:$0xff]  }
  0xd2   : > { %1060 = vmatprep.subr.bf16.mxu0 %v1750_v8  ;;  %1020 = vmatpush1.bf16.msra.mxu1 %v1745_v9  ;;  %v778_v8 = vld [vmem:[#allocation8 + $0x5] sm:$0x1f] }
  0xd3   : > { %1021 = vmatprep.subr.bf16.mxu1 %v1753_v11  ;;  %v783_v9 = vrot.slane %v778_v8, %v344_v21 }
  0xd5   : > { %1061 = vmatpush1.bf16.msra.mxu0 %v1748_v10 }
  0xd6   : > { %1062 = vmatprep.subr.bf16.mxu0 %v1756_v12  ;;  %1022 = vmatpush1.bf16.msra.mxu1 %v1751_v13 }
  0xd7   : > { %1023 = vmatprep.subr.bf16.mxu1 %v1759_v15 }
  0xd9   : > { %1063 = vmatpush1.bf16.msra.mxu0 %v1754_v14 }
  0xda   : > { %1064 = vmatprep.subr.bf16.mxu0 %v1762_v16  ;;  %1024 = vmatpush1.bf16.msra.mxu1 %v1757_v17 }
  0xdd   : > { %1065 = vmatpush1.bf16.msra.mxu0 %v1760_v18 }
  0xde   : > { %1066 = vmatprep.subr.bf16.mxu0 %v1768_v32  ;;  %v1784_v32 = vld [vmem:[#allocation9 + $0x8] sm:$0xff]  }
  0xe1   : > { %1067 = vmatpush1.bf16.msra.mxu0 %v1766_v35  ;;  %v1787_v35 = vld [vmem:[#allocation9 + $0x20] sm:$0xff]  }
  0xe2   : > { %1068 = vmatprep.subr.bf16.mxu0 %v1774_v42 }
  0xe5   : > { %1069 = vmatpush1.bf16.msra.mxu0 %v1772_v43  ;;  %v791_v43 = vrot.slane %v778_v8, %v352_v44 }
  0xe6   : > { %1565 = vmatprep.subr.bf16.mxu0 %v1992_v31 }
 0x17b   : > { %v609_v24 = vpop.f32.mrb[0].mxu0 }
 0x17c   : > { %v2243_v25 = vadd.f32 %v609_v24, %v345_v23  ;;  %v2245_v26 = vpop.f32.mrb[1].mxu0 }
 0x17d   : > { %v613_v27 = vpop.f32.mrb[2].mxu0  ;;  %v612_v60 = vadd.f32 %v2245_v26, %v349_v51  ;;  %v1777_v26 = vld [vmem:[#allocation6 + $0x1a0] ss:$20 sps:$4 sm:$0xff]  }
 0x17e   : > { %v614_v28 = vpop.f32.mrb[3].mxu0  ;;  %697 = vmax.xlane.f32.xlu0 %v2243_v25 }
 0x17f   : > { %v1765_v28 = vld [vmem:[#allocation6 + $0x234] ss:$20 sps:$4 sm:$0xff]  }
 0x180   : > { %1025 = vmatprep.subr.bf16.mxu1 %v1765_v28 }
 0x181   : > { %1026 = vmatpush1.bf16.msra.mxu1 %v1763_v30  ;;  %v1783_v30 = vld [vmem:[#allocation9] sm:$0xff]  }
 0x182   : > { %v650_v19 = vpop.f32.mrb[0].mxu1  ;;  %1027 = vmatprep.subr.bf16.mxu1 %v1771_v39 }
 0x183   : > { %v652_v29 = vpop.f32.mrb[1].mxu1 }
 0x184   : > { %v654_v33 = vpop.f32.mrb[2].mxu1  ;;  %v653_v59 = vadd.f32 %v652_v29, %v357_v50  ;;  %v795_v50 = vrot.slane %v778_v8, %v356_v45 }
 0x185   : > { %v655_v36 = vpop.f32.mrb[3].mxu1  ;;  %1028 = vmatpush1.bf16.msra.mxu1 %v1769_v41  ;;  %v1785_v33 = vld [vmem:[#allocation9 + $0x10] sm:$0xff]   ;;  %v1790_v41 = vld [vmem:[#allocation9 + $0x38] sm:$0xff]  }
 0x186   : > { %1545 = vmatprep.subr.bf16.mxu1 %v1992_v31 }
 0x19b   : > { %v691_v34 = vpop.f32.mrb[4].mxu0 }
 0x19c   : > { %v1543_v37 = vpop.f32.mrb[5].mxu0  ;;  %v692_v61 = vadd.f32 %v691_v34, %v361_v53  ;;  %v1786_v34 = vld [vmem:[#allocation9 + $0x18] sm:$0xff]   ;;  %v799_v53 = vrot.slane %v778_v8, %v360_v47 }
 0x19d   : > { %v694_v38 = vpop.f32.mrb[6].mxu0 }
 0x19e   : > { %v1544_v40 = vpop.f32.mrb[7].mxu0 }
 0x19f   : > { %v1789_v40 = vld [vmem:[#allocation9 + $0x30] sm:$0xff]  }
 0x20b   : > { %v698_v55 = vpop.xlane.xlu0 %697 }
 0x20c   : > { %vm699_vm2 = vcmp.eq.f32.partialorder %v2243_v25, %v698_v55 }
 0x20d   : > { %v700_v56 = vsel %vm699_vm2, %v2263_v54, 128 }
 0x20e   : > { %v702_v57 = vshra.s32 %v700_v56, 16  ;;  %v701_v23 = vand.u32 65535, %v700_v56 }
 0x210   : > { %v704_v58 = vcvt.s32.f32 %v702_v57  ;;  %v703_v25 = vcvt.s32.f32 %v701_v23  ;;  %v651_v57 = vadd.f32 %v650_v19, %v353_v49 }
 0x212   : > { %705 = vmin.xlane.f32.xlu0 %v704_v58 }
 0x29f   : > { %v706_v24 = vpop.xlane.xlu0 %705 }
 0x2a0   : > { %vm707_vm3 = vcmp.eq.f32.partialorder %v704_v58, %v706_v24  ;;  %v712_v48 = vcvt.f32.s32 %v706_v24 }
 0x2a1   : > { %v708_v27 = vsel %vm707_vm3, %v703_v25, inf }
 0x2a2   : > { %709 = vmin.xlane.f32.xlu1 %v708_v27  ;;  %v713_v55 = vshll.u32 %v712_v48, 16  ;;  %v787_v48 = vrot.slane %v778_v8, %v348_v46 }
 0x32f   : > { %v710_v52 = vpop.xlane.xlu1 %709 }
 0x330   : > { %v711_v56 = vcvt.f32.s32 %v710_v52 }
 0x332   : > { %v714_v58 = vadd.s32 %v713_v55, %v711_v56 }
 0x334   : > { %vm715_vm4 = vcmp.eq.s32.totalorder %v714_v58, 1  ;;  %vm719_vm5 = vcmp.eq.s32.totalorder %v714_v58, 2  ;;  %vm723_vm6 = vcmp.eq.s32.totalorder %v714_v58, 3 }
 0x335   : > { %v718_v62 = vsel %vm715_vm4, %v651_v57, %v612_v60 }
 0x336   : > { %v722_v63 = vsel %vm719_vm5, %v653_v59, %v718_v62 }
 0x337   : > { %v726_v1 = vsel %vm723_vm6, %v692_v61, %v722_v63 }
 0x338   : > { %v727_v2 = vpack.c.bf16 %v726_v1, %v726_v1 }
 0x33a   : > { %1046 = vmatmul.mubr.bf16.vlgmr.msra.gmra.mrb[4].mxu1 %v727_v2  ;;  %1087 = vmatmul.mubr.bf16.vlgmr.msra.gmra.mrb[8].mxu0 %v727_v2 }
 0x33b   : > { %1546 = vmatpush3.bf16.msra.mxu1 %v1775_v0  ;;  %1561 = vmatprep.mubr.msk.bf16.mxu1 %vm1993_vm1, %v1992_v31 }
 0x33c   : > { %1547 = vmatprep.subr.bf16.mxu1 %v1992_v31  ;;  %1581 = vmatprep.mubr.msk.bf16.mxu0 %vm1993_vm1, %v1992_v31 }
 0x33d   : > { %1566 = vmatpush3.bf16.msra.mxu0 %v1783_v30 }
 0x33e   : > { %1567 = vmatprep.subr.bf16.mxu0 %v1992_v31 }
 0x33f   : > { %1548 = vmatpush3.bf16.msra.mxu1 %v1776_v22 }
 0x340   : > { %1549 = vmatprep.subr.bf16.mxu1 %v1992_v31 }
 0x341   : > { %1568 = vmatpush3.bf16.msra.mxu0 %v1784_v32 }
 0x342   : > { %1569 = vmatprep.subr.bf16.mxu0 %v1992_v31 }
 0x343   : > { %1550 = vmatpush3.bf16.msra.mxu1 %v1777_v26 }
 0x344   : > { %1551 = vmatprep.subr.bf16.mxu1 %v1992_v31 }
 0x345   : > { %1570 = vmatpush3.bf16.msra.mxu0 %v1785_v33 }
 0x346   : > { %1571 = vmatprep.subr.bf16.mxu0 %v1992_v31 }
 0x347   : > { %1552 = vmatpush3.bf16.msra.mxu1 %v1778_v3 }
 0x348   : > { %1553 = vmatprep.subr.bf16.mxu1 %v1992_v31 }
 0x349   : > { %1572 = vmatpush3.bf16.msra.mxu0 %v1786_v34 }
 0x34a   : > { %1573 = vmatprep.subr.bf16.mxu0 %v1992_v31 }
 0x34b   : > { %1554 = vmatpush3.bf16.msra.mxu1 %v1779_v4 }
 0x34c   : > { %1555 = vmatprep.subr.bf16.mxu1 %v1992_v31 }
 0x34d   : > { %1574 = vmatpush3.bf16.msra.mxu0 %v1787_v35 }
 0x34e   : > { %1575 = vmatprep.subr.bf16.mxu0 %v1992_v31 }
 0x34f   : > { %1556 = vmatpush3.bf16.msra.mxu1 %v1780_v5 }
 0x350   : > { %1557 = vmatprep.subr.bf16.mxu1 %v1992_v31 }
 0x353   : > { %1558 = vmatpush3.bf16.msra.mxu1 %v1781_v6 }
 0x354   : > { %1559 = vmatprep.subr.bf16.mxu1 %v1992_v31 }
 0x357   : > { %1560 = vmatpush3.bf16.msra.mxu1 %v1782_v7 }
 0x35a   : > { %1562 = vmatmul.mubr.bf16.vlgmr.msra.gmra.mrb[8].mxu1 %v727_v2 }
 0x40d   : > { %v1047_v10 = vpop.f32.mrb[4].mxu1  ;;  %v1088_v11 = vpop.f32.mrb[8].mxu0 }
 0x40e   : > { %v1048_v12 = vadd.f32 %v1047_v10, %v783_v9  ;;  %v1049_v13 = vpop.f32.mrb[5].mxu1  ;;  %v1090_v14 = vpop.f32.mrb[9].mxu0  ;;  %v1089_v55 = vadd.f32 %v1088_v11, %v791_v43 }
 0x40f   : > { %v1051_v15 = vpop.f32.mrb[6].mxu1  ;;  %v1092_v16 = vpop.f32.mrb[10].mxu0  ;;  %v1050_v56 = vadd.f32 %v1049_v13, %v787_v48  ;;  %v1091_v57 = vadd.f32 %v1090_v14, %v795_v50 }
 0x410   : > { %v1052_v17 = vpop.f32.mrb[7].mxu1  ;;  %v1093_v18 = vpop.f32.mrb[11].mxu0  ;;  %1135 = vmax.xlane.f32.xlu1 %v1048_v12 }
 0x42d   : > { %v1129_v19 = vpop.f32.mrb[8].mxu1 }
 0x42e   : > { %v1563_v23 = vpop.f32.mrb[9].mxu1  ;;  %v1130_v44 = vadd.f32 %v1129_v19, %v799_v53 }
 0x42f   : > { %v1132_v24 = vpop.f32.mrb[10].mxu1 }
 0x430   : > { %v1564_v25 = vpop.f32.mrb[11].mxu1 }
 0x49d   : > { %v1136_v27 = vpop.xlane.xlu1 %1135 }
 0x49e   : > { %vm1137_vm7 = vcmp.eq.f32.partialorder %v1048_v12, %v1136_v27 }
 0x49f   : > { %v1138_v28 = vsel %vm1137_vm7, %v2263_v54, 128  ;;  %v1788_v54 = vld [vmem:[#allocation9 + $0x28] sm:$0xff]  }
 0x4a0   : > { %v1140_v29 = vshra.s32 %v1138_v28, 16  ;;  %1576 = vmatpush3.bf16.msra.mxu0 %v1788_v54  ;;  %v1139_v36 = vand.u32 65535, %v1138_v28 }
 0x4a1   : > { %1577 = vmatprep.subr.bf16.mxu0 %v1992_v31 }
 0x4a2   : > { %v1142_v21 = vcvt.s32.f32 %v1140_v29  ;;  %v1141_v38 = vcvt.s32.f32 %v1139_v36 }
 0x4a4   : > { %1143 = vmin.xlane.f32.xlu0 %v1142_v21  ;;  %1578 = vmatpush3.bf16.msra.mxu0 %v1789_v40 }
 0x4a5   : > { %1579 = vmatprep.subr.bf16.mxu0 %v1992_v31 }
 0x4a8   : > { %1580 = vmatpush3.bf16.msra.mxu0 %v1790_v41 }
 0x531   : > { %v1144_v37 = vpop.xlane.xlu0 %1143 }
 0x532   : > { %vm1145_vm8 = vcmp.eq.f32.partialorder %v1142_v21, %v1144_v37  ;;  %v1150_v42 = vcvt.f32.s32 %v1144_v37 }
 0x533   : > { %v1146_v39 = vsel %vm1145_vm8, %v1141_v38, inf }
 0x534   : > { %1147 = vmin.xlane.f32.xlu1 %v1146_v39  ;;  %v1151_v51 = vshll.u32 %v1150_v42, 16 }
 0x5c1   : > { %v1148_v49 = vpop.xlane.xlu1 %1147 }
 0x5c2   : > { %v1149_v52 = vcvt.f32.s32 %v1148_v49 }
 0x5c4   : > { %v1152_v31 = vadd.s32 %v1151_v51, %v1149_v52 }
 0x5c6   : > { %vm1153_vm9 = vcmp.eq.s32.totalorder %v1152_v31, 1  ;;  %vm1157_vm10 = vcmp.eq.s32.totalorder %v1152_v31, 2  ;;  %vm1161_vm11 = vcmp.eq.s32.totalorder %v1152_v31, 3 }
 0x5c7   : > { %v1156_v58 = vsel %vm1153_vm9, %v1089_v55, %v1050_v56 }
 0x5c8   : > { %v1160_v46 = vsel %vm1157_vm10, %v1091_v57, %v1156_v58 }
 0x5c9   : > { %v1164_v59 = vsel %vm1161_vm11, %v1130_v44, %v1160_v46 }
 0x5ca   : > { %v1165_v45 = vpack.c.bf16 %v1164_v59, %v1164_v59 }
 0x5cc   : > { %1582 = vmatmul.mubr.bf16.vlgmr.msra.gmra.mrb[12].mxu0 %v1165_v45 }
 0x69f   : > { %v1271_v47 = vpop.f32.mrb[12].mxu0 }
 0x6a0   : > { %v1272_v60 = vadd.f32 %v1485_v20, %v1271_v47  ;;  %v1583_v61 = vpop.f32.mrb[13].mxu0 }
 0x6a1   : > { %v1274_v62 = vpop.f32.mrb[14].mxu0 }
 0x6a2   : > { %1277 = vst [vmem:[%s283_s28] sm:$0xff] %v1272_v60  ;;  %v1584_v63 = vpop.f32.mrb[15].mxu0 }
 0x6a3   : > { %1918 = shalt.err (!%p1915_p4)
}
 0x6a4   : > { %s1919_s14 = scalar_lea.hbm %s2323_s29, 128  ;;  %s1923_s24 = scalar_lea.hbm %s2372_s5, 256 }
 0x6a5   : > { %p1920_p0 = scmp.ne.s32.totalorder %s2323_s29, %s1919_s14  ;;  %p1924_p11 = scmp.lt.u32.totalorder %s2323_s29, %s2372_s5 }
 0x6a6   : > { %p1925_p13 = scmp.lt.u32.totalorder %s1923_s24, %s1919_s14  ;;  %p1927_p10 = scmp.lt.u32.totalorder %s1919_s14, %s2323_s29 }
 0x6a7   : > { %p1921_p9 = pnand %p1920_p0, %p2167_p5 }
 0x6a8   : > { %p1926_p6 = por %p1925_p13, %p1924_p11 }
 0x6a9   : > { %p1922_p8 = pneg %p1921_p9 }
 0x6aa   : > { %p1928_p3 = por %p1927_p10, %p1926_p6 }
 0x6ac   : > { %p1929_p7 = pnand %p1928_p3, %p1922_p8 }
 0x6ae   : > { %1932 = shalt.err (!%p1929_p7)
}
 0x6af   : > { %1599 = dma.vmem_to_hbm [thread:$0]  (%p2167_p5), %s2325_s12, 128, %s2323_s29, %s1279_s9  }
 0x6b0 PF: > { %s1304_s6 = sand.u32 1, %s1967_s18   ;;  %p2390_p12 = scmp.ne.s32.totalorder %s2377_s25, 0 }
 0x6b1   : > { %p2391_p2 = scmp.ge.s32.totalorder %s1979_s21, 2  ;;  %s1305_s28 = scalar_lea.sflag [#allocation5], %s1304_s6 }
 0x6b3   : > { %p1616_p1 = pnand %p2391_p2, %p2390_p12 }
 0x6b5   : > { %1962 = dma.done.wait (!%p1616_p1), %s1305_s28, 128  }
 0x6b6   : > { %1964 = vsyncadd (!%p1616_p1), %s1305_s28, 4294967168  ;;  %p20_p4 = scmp.ge.s32.totalorder %s2153_s16, 4   ;;  %s2392_s18 = smov %s1971_s19 }
 0x6b7   : > { %s2393_s19 = smov %s1975_s20  ;;  %s2394_s20 = smov %s2163_s30 }
 0x6b8   : > { %s2395_s21 = smov %s2153_s16  ;;  %22 = sbr.rel (!%p20_p4) target bundleno = 7 (0x7), region = 99 }
 0x6bf   :  { %1310 = vsyncpa [#allocation4], 1 }
 0x6c0   :  { %1312 = vsyncpa [#allocation4 + $0x1], 1 }
 0x6c1   :  { %1313 = vsyncpa [#allocation7], 1 }
 0x6c2   :  { %1314 = vsyncpa [#allocation10], 1 }
 0x6c3   :  { %1315 = vsyncpa [#allocation5], 1 }
 0x6c4   :  { %1317 = vsyncpa [#allocation5 + $0x1], 1 }

</bundles_post_ra>
